<compile_context>
chip_gen: v7x
topology: tpu7x:2x2x1
jax: 0.10.0
libtpu: 0.0.40
codegen_flags: <defaults>
</compile_context>

<pallas_src>
import functools

import jax
import jax.numpy as jnp
from jax import lax
from jax.experimental import pallas as pl
from jax.experimental.pallas import tpu as pltpu

_LANE = 128      # lane width (last dim tiling)
_SUBLANE = 8     # sublane width (second-to-last dim tiling)


def _round_up(x, m):
    return (x + m - 1) // m * m


def _vmem_capacity_bytes():
    """Physical VMEM per core (128 MiB v5e/v6e, 64 MiB v7x); conservative fallback."""
    try:
        cap = getattr(pltpu.get_tpu_info(), "vmem_capacity_bytes", None)
        if cap:
            return int(cap)
    except Exception:
        pass
    return 64 * 1024 * 1024


def _chunk_vmem_bytes(t_chunk, bb, hp, x_bytes, w_bytes):
    """Rough per-chunk VMEM footprint (pipeline double buffers + scratch)."""
    x_blk = 2 * t_chunk * bb * hp * x_bytes               # input block
    out_blk = 2 * t_chunk * bb * hp * 4                   # f32 output block
    wi_sc = t_chunk * bb * 4 * hp * 4                     # fused-projection scratch
    weights = 2 * 2 * (hp * 4 * hp * w_bytes)             # W_ih + W_hh
    states = 4 * 2 * (bb * hp * 4) + 2 * (bb * hp * 4)    # h0/c0/hn/cn blocks + carries
    bias = 2 * 4 * hp * 4
    return x_blk + out_blk + wi_sc + weights + states + bias


def _pick_time_chunk(T, bb, hp, x_bytes, w_bytes, budget, max_chunk):
    """Largest time chunk <= max_chunk whose VMEM estimate fits the budget.

    No divisor-of-T constraint: T is padded up to a multiple of the chunk and the
    tail timesteps are masked inside the kernel, so awkward/prime T never falls
    back to chunk=1 (which would pay the ~0.35us grid overhead per timestep).
    """
    for c in range(min(T, max_chunk), 0, -1):
        if _chunk_vmem_bytes(c, bb, hp, x_bytes, w_bytes) <= budget:
            return c
    return 1


def _pick_batch_block(bp, max_block=128):
    """Largest multiple-of-8 divisor of bp that is <= max_block.

    bp > max_block yields several batch blocks; the leading "parallel" grid axis
    then feeds both TensorCores on v7x (single block at v5e/v6e-sized batches).
    """
    bb = min(bp, max_block)
    while bp % bb:
        bb -= _SUBLANE
    return bb


def _lstm_kernel(x_ref, h0_ref, c0_ref, wih_ref, whh_ref, bias_ref,
                 out_ref, hn_ref, cn_ref,
                 wi_sc, h_sc, c_sc,
                 *, t_chunk, bb, hidden, t_total, mask_tail, mxu_dtype, unroll):
    """One grid step == (one batch block, one chunk of t_chunk timesteps).

    Grid = (n_batch_blocks "parallel", n_time_chunks "arbitrary"); time iterates
    innermost, so the h/c carry scratch is valid across a batch block's chunks.
    """
    c_idx = pl.program_id(1)
    H = hidden

    @pl.when(c_idx == 0)
    def _():
        h_sc[...] = h0_ref[...]
        c_sc[...] = c0_ref[...]

    # ---- Fused input projection: one chunk-wide MXU matmul (no serial dependency).
    #      Replaces the old f32 (T, B, 4H) wi_all HBM round trip. ----
    x = x_ref[...].reshape(t_chunk * bb, H).astype(mxu_dtype)
    wi = jnp.dot(x, wih_ref[...], preferred_element_type=jnp.float32)
    wi_sc[...] = wi + bias_ref[...]

    whh = whh_ref[...]                      # hoist recurrent weight load out of loop
    t_base = c_idx * t_chunk

    def step(t, carry):
        h = h_sc[...]                       # (bb, Hp) f32 carry
        c = c_sc[...]
        row = pl.multiple_of(t * bb, bb)
        gates = wi_sc[pl.ds(row, bb), :] + jnp.dot(
            h.astype(mxu_dtype), whh, preferred_element_type=jnp.float32)
        # Gate-major padded layout: each gate is a lane-aligned Hp-wide slab.
        f = gates[:, 0 * H:1 * H]
        i = gates[:, 1 * H:2 * H]
        o = gates[:, 2 * H:3 * H]
        g = gates[:, 3 * H:4 * H]
        c1 = jax.nn.sigmoid(f) * c + jax.nn.sigmoid(i) * jnp.tanh(g)
        h1 = jax.nn.sigmoid(o) * jnp.tanh(c1)
        if mask_tail:
            # Padded tail timesteps keep the previous state (mirrors the module's
            # `time < length` mask; length == max_time for every real step).
            valid = (t_base + t) < t_total
            h1 = jnp.where(valid, h1, h)
            c1 = jnp.where(valid, c1, c)
        h_sc[...] = h1
        c_sc[...] = c1
        out_ref[t] = h1.astype(out_ref.dtype)   # VMEM store; HBM writeback once/chunk
        return carry

    lax.fori_loop(0, t_chunk, step, 0, unroll=unroll)

    # Final state is emitted only on the last chunk (resident output blocks).
    @pl.when(c_idx == pl.num_programs(1) - 1)
    def _():
        hn_ref[...] = h_sc[...].astype(hn_ref.dtype)
        cn_ref[...] = c_sc[...].astype(cn_ref.dtype)


def single_layer_lstm_forward(input_, hx, params, *,
                              mxu_dtype=jnp.bfloat16, max_time_chunk=128):
    """input_: (T, B, input_size); hx = (h0, c0) each (1, B, H).

    Returns (output, (h_n, c_n)) matching SingleLayerLSTM.forward.  mxu_dtype is
    the dtype of the matmul operands (bf16 = MXU-native performance default on
    v5e/v6e/v7x); accumulation, carries and gate math stay in f32 in all modes.
    """
    W_ih, W_hh, bias = params["W_ih"], params["W_hh"], params["bias"]
    T, B, in_size = input_.shape
    H = W_hh.shape[0]
    assert in_size == H, "module pads input to 4H, which requires input_size == hidden_size"

    Hp = _round_up(H, _LANE)
    Bp = _round_up(B, _SUBLANE)
    dH, dB = Hp - H, Bp - B

    h0 = jnp.squeeze(hx[0], axis=0).astype(jnp.float32)   # (B, H) mirrors h_0.squeeze()
    c0 = jnp.squeeze(hx[1], axis=0).astype(jnp.float32)

    # Gate-aware padding: pad each gate's H columns to Hp so every gate is a
    # lane-aligned slab of the padded 4*Hp axis.  Padded rows/cols are zero, so the
    # padded hidden region stays exactly zero through the recurrence.
    W_ih_top = W_ih[:in_size, :]                                          # (H, 4H)
    W_ih_p = jnp.pad(W_ih_top.reshape(H, 4, H),
                     ((0, dH), (0, 0), (0, dH))).reshape(Hp, 4 * Hp).astype(mxu_dtype)
    W_hh_p = jnp.pad(W_hh.reshape(H, 4, H),
                     ((0, dH), (0, 0), (0, dH))).reshape(Hp, 4 * Hp).astype(mxu_dtype)
    bias_p = jnp.pad(bias.reshape(4, H),
                     ((0, 0), (0, dH))).reshape(1, 4 * Hp).astype(jnp.float32)

    bb = _pick_batch_block(Bp)
    n_bb = Bp // bb

    # Budget-driven time chunking (VMEM differs per generation) + T padding.
    vmem_cap = _vmem_capacity_bytes()
    budget = vmem_cap // 2
    w_bytes = jnp.dtype(mxu_dtype).itemsize
    t_chunk = _pick_time_chunk(T, bb, Hp, 4, w_bytes, budget, max_time_chunk)
    T_pad = _round_up(T, t_chunk)
    n_chunks = T_pad // t_chunk
    mask_tail = T_pad != T

    # x stays f32 in HBM and is cast to mxu_dtype right before the fused projection.
    # TODO(synk): optionally store x in bf16 to halve its HBM stream as well.
    x_p = jnp.pad(input_.astype(jnp.float32),
                  ((0, T_pad - T), (0, dB), (0, dH)))                     # (T_pad, Bp, Hp)
    h0_p = jnp.pad(h0, ((0, dB), (0, dH)))                                # (Bp, Hp)
    c0_p = jnp.pad(c0, ((0, dB), (0, dH)))

    unroll = min(t_chunk, 16)
    kernel = functools.partial(
        _lstm_kernel, t_chunk=t_chunk, bb=bb, hidden=Hp, t_total=T,
        mask_tail=mask_tail, mxu_dtype=mxu_dtype, unroll=unroll)

    out_shapes = (
        jax.ShapeDtypeStruct((T_pad, Bp, Hp), jnp.float32),   # stacked h over time
        jax.ShapeDtypeStruct((Bp, Hp), jnp.float32),          # h_n
        jax.ShapeDtypeStruct((Bp, Hp), jnp.float32),          # c_n
    )

    grid_spec = pltpu.PrefetchScalarGridSpec(
        num_scalar_prefetch=0,
        grid=(n_bb, n_chunks),
        in_specs=[
            pl.BlockSpec((t_chunk, bb, Hp), lambda b, c: (c, b, 0)),   # x
            pl.BlockSpec((bb, Hp), lambda b, c: (b, 0)),               # h0
            pl.BlockSpec((bb, Hp), lambda b, c: (b, 0)),               # c0
            pl.BlockSpec((Hp, 4 * Hp), lambda b, c: (0, 0)),           # W_ih (resident)
            pl.BlockSpec((Hp, 4 * Hp), lambda b, c: (0, 0)),           # W_hh (resident)
            pl.BlockSpec((1, 4 * Hp), lambda b, c: (0, 0)),            # bias
        ],
        out_specs=[
            pl.BlockSpec((t_chunk, bb, Hp), lambda b, c: (c, b, 0)),   # output
            pl.BlockSpec((bb, Hp), lambda b, c: (b, 0)),               # h_n (resident)
            pl.BlockSpec((bb, Hp), lambda b, c: (b, 0)),               # c_n (resident)
        ],
        scratch_shapes=[
            pltpu.VMEM((t_chunk * bb, 4 * Hp), jnp.float32),           # fused projection
            pltpu.VMEM((bb, Hp), jnp.float32),                         # h carry
            pltpu.VMEM((bb, Hp), jnp.float32),                         # c carry
        ],
    )

    out_p, hn_p, cn_p = pl.pallas_call(
        kernel,
        out_shape=out_shapes,
        grid_spec=grid_spec,
        compiler_params=pltpu.CompilerParams(
            # Batch blocks are independent -> "parallel" (feeds v7x's 2nd TC when
            # n_bb >= 2); the time recurrence must stay "arbitrary".
            dimension_semantics=("parallel", "arbitrary"),
            vmem_limit_bytes=min(int(vmem_cap * 0.85), 128 * 1024 * 1024),
        ),
    )(x_p, h0_p, c0_p, W_ih_p, W_hh_p, bias_p)

    output = out_p[:T, :B, :H].astype(input_.dtype)
    h_n = hn_p[:B, :H].astype(input_.dtype)
    c_n = cn_p[:B, :H].astype(input_.dtype)
    return output, (h_n, c_n)


def init_params(key, hidden_size):
    """Deterministic parameter init mirroring LSTMCell.reset_parameters()."""
    H = hidden_size
    W_hh = jnp.tile(jnp.eye(H, dtype=jnp.float32), (1, 4))          # eye(H).repeat(1,4)
    bias = jnp.zeros((4 * H,), dtype=jnp.float32)
    # TODO(synk): sl.StructuredLinear replaced by a dense deterministic (4H, 4H) stand-in.
    W_ih = 0.1 * jax.random.normal(key, (4 * H, 4 * H), dtype=jnp.float32)
    return {"W_ih": W_ih, "W_hh": W_hh, "bias": bias}


def _reference_forward(input_, hx, params, *, precision=None):
    """Pure-JAX reference of the PyTorch forward (f32, optional dot precision)."""
    W_ih, W_hh, bias = params["W_ih"], params["W_hh"], params["bias"]
    T, B, in_size = input_.shape
    H = W_hh.shape[0]
    h = jnp.squeeze(hx[0], axis=0)
    c = jnp.squeeze(hx[1], axis=0)

    def step(carry, x_t):
        h, c = carry
        wh_b = bias[None, :] + jnp.dot(h, W_hh, precision=precision)
        x_pad = jnp.concatenate([x_t, jnp.zeros((B, 3 * H), x_t.dtype)], axis=1)
        wi = jnp.dot(x_pad, W_ih, precision=precision)
        gates = wh_b + wi
        f, i, o, g = jnp.split(gates, 4, axis=1)
        c1 = jax.nn.sigmoid(f) * c + jax.nn.sigmoid(i) * jnp.tanh(g)
        h1 = jax.nn.sigmoid(o) * jnp.tanh(c1)
        return (h1, c1), h1

    (h_n, c_n), out = jax.lax.scan(step, (h, c), input_)
    return out, (h_n, c_n)


def _check(name, got, want, atol, rtol):
    ok = bool(jnp.allclose(got, want, atol=atol, rtol=rtol))
    assert ok, f"{name} mismatch (atol={atol}, rtol={rtol})"


if __name__ == "__main__":
    T, B, H = 8, 2, 32          # max_time, batch, hidden_size (== input_size)

    key = jax.random.PRNGKey(0)
    k_w, k_x, k_h, k_c, k_x2 = jax.random.split(key, 5)

    params = init_params(k_w, H)
    input_ = jax.random.normal(k_x, (T, B, H), dtype=jnp.float32)
    h0 = jax.random.normal(k_h, (1, B, H), dtype=jnp.float32)
    c0 = jax.random.normal(k_c, (1, B, H), dtype=jnp.float32)

    ref_out, (ref_h, ref_c) = _reference_forward(
        input_, (h0, c0), params, precision=lax.Precision.HIGHEST)

    # --- 1) performance config: bf16 MXU operands, fused in-kernel projection.
    #     Tolerance accounts for bf16 operand rounding through an 8-step recurrence.
    out_bf, (hn_bf, cn_bf) = single_layer_lstm_forward(input_, (h0, c0), params)
    jax.block_until_ready((out_bf, hn_bf, cn_bf))
    _check("output[bf16]", out_bf, ref_out, 0.15, 0.15)
    _check("h_n[bf16]", hn_bf, ref_h, 0.15, 0.15)
    _check("c_n[bf16]", cn_bf, ref_c, 0.15, 0.15)

    # --- 2) f32 MXU mode (reference-check mode retained).
    out_f, (hn_f, cn_f) = single_layer_lstm_forward(
        input_, (h0, c0), params, mxu_dtype=jnp.float32)
    jax.block_until_ready((out_f, hn_f, cn_f))
    _check("output[f32]", out_f, ref_out, 0.15, 0.15)
    _check("h_n[f32]", hn_f, ref_h, 0.15, 0.15)
    _check("c_n[f32]", cn_f, ref_c, 0.15, 0.15)

    # --- 3) non-divisible T with a forced small chunk: exercises multi-chunk carry,
    #     T padding and in-kernel tail masking.  Must match the single-chunk run of
    #     the same kernel essentially bit-for-bit.
    T2 = 6
    input2 = jax.random.normal(k_x2, (T2, B, H), dtype=jnp.float32)
    out2a, (hn2a, cn2a) = single_layer_lstm_forward(
        input2, (h0, c0), params, max_time_chunk=4)     # 2 chunks, 2 masked tail steps
    out2b, (hn2b, cn2b) = single_layer_lstm_forward(
        input2, (h0, c0), params)                       # single chunk, no masking
    jax.block_until_ready((out2a, hn2a, cn2a, out2b, hn2b, cn2b))
    _check("output[chunked==unchunked]", out2a, out2b, 1e-4, 1e-4)
    _check("h_n[chunked==unchunked]", hn2a, hn2b, 1e-4, 1e-4)
    _check("c_n[chunked==unchunked]", cn2a, cn2b, 1e-4, 1e-4)
    ref2_out, (ref2_h, ref2_c) = _reference_forward(
        input2, (h0, c0), params, precision=lax.Precision.HIGHEST)
    _check("output[chunked vs ref]", out2a, ref2_out, 0.15, 0.15)
    _check("h_n[chunked vs ref]", hn2a, ref2_h, 0.15, 0.15)
    _check("c_n[chunked vs ref]", cn2a, ref2_c, 0.15, 0.15)

    print("KERNEL_OK")
</pallas_src>

<mosaic_0001>
module attributes {stable_mosaic.version = 11 : i64} {
  func.func @_lstm_kernel(%arg0: i32, %arg1: i32, %arg2: memref<8x8x128xf32, #tpu.memory_space<vmem>>, %arg3: memref<8x128xf32, #tpu.memory_space<vmem>>, %arg4: memref<8x128xf32, #tpu.memory_space<vmem>>, %arg5: memref<128x512xbf16, #tpu.memory_space<vmem>>, %arg6: memref<128x512xbf16, #tpu.memory_space<vmem>>, %arg7: memref<1x512xf32, #tpu.memory_space<vmem>>, %arg8: memref<8x8x128xf32, #tpu.memory_space<vmem>>, %arg9: memref<8x128xf32, #tpu.memory_space<vmem>>, %arg10: memref<8x128xf32, #tpu.memory_space<vmem>>, %arg11: memref<64x512xf32, #tpu.memory_space<vmem>>, %arg12: memref<8x128xf32, #tpu.memory_space<vmem>>, %arg13: memref<8x128xf32, #tpu.memory_space<vmem>>) attributes {dimension_semantics = [#tpu.dimension_semantics<parallel>, #tpu.dimension_semantics<arbitrary>], iteration_bounds = array<i64: 1, 1>, scalar_prefetch = 0 : i64, scratch_operands = 3 : i64, tpu.core_type = #tpu.core_type<tc>, window_params = [{transform_indices = @transform_0, window_bounds = array<i64: 8, 8, 128>}, {transform_indices = @transform_1, window_bounds = array<i64: 8, 128>}, {transform_indices = @transform_2, window_bounds = array<i64: 8, 128>}, {pipeline_mode = #tpu.pipeline_mode<synchronous>, transform_indices = @transform_3, window_bounds = array<i64: 128, 512>}, {pipeline_mode = #tpu.pipeline_mode<synchronous>, transform_indices = @transform_4, window_bounds = array<i64: 128, 512>}, {pipeline_mode = #tpu.pipeline_mode<synchronous>, transform_indices = @transform_5, window_bounds = array<i64: 1, 512>}, {transform_indices = @transform_6, window_bounds = array<i64: 8, 8, 128>}, {transform_indices = @transform_7, window_bounds = array<i64: 8, 128>}, {transform_indices = @transform_8, window_bounds = array<i64: 8, 128>}]} {
    %c0_i32 = arith.constant 0 : i32
    %0 = arith.cmpi eq, %arg1, %c0_i32 : i32
    %1 = arith.extui %0 : i1 to i32
    %c0_i32_0 = arith.constant 0 : i32
    %2 = arith.cmpi ne, %1, %c0_i32_0 : i32
    scf.if %2 {
      %c0_142 = arith.constant 0 : index
      %c0_143 = arith.constant 0 : index
      %336 = vector.load %arg3[%c0_142, %c0_143] : memref<8x128xf32, #tpu.memory_space<vmem>>, vector<8x128xf32>
      %c0_144 = arith.constant 0 : index
      %c0_145 = arith.constant 0 : index
      %337 = vector.load %arg12[%c0_144, %c0_145] : memref<8x128xf32, #tpu.memory_space<vmem>>, vector<8x128xf32>
      tpu.vector_store %arg12[%c0_144, %c0_145], %336 {strides = array<i32>} : memref<8x128xf32, #tpu.memory_space<vmem>>, vector<8x128xf32>,
      %c0_146 = arith.constant 0 : index
      %c0_147 = arith.constant 0 : index
      %338 = vector.load %arg4[%c0_146, %c0_147] : memref<8x128xf32, #tpu.memory_space<vmem>>, vector<8x128xf32>
      %c0_148 = arith.constant 0 : index
      %c0_149 = arith.constant 0 : index
      %339 = vector.load %arg13[%c0_148, %c0_149] : memref<8x128xf32, #tpu.memory_space<vmem>>, vector<8x128xf32>
      tpu.vector_store %arg13[%c0_148, %c0_149], %338 {strides = array<i32>} : memref<8x128xf32, #tpu.memory_space<vmem>>, vector<8x128xf32>,
    } else {
    }
    %c0 = arith.constant 0 : index
    %c0_1 = arith.constant 0 : index
    %c0_2 = arith.constant 0 : index
    %3 = vector.load %arg2[%c0, %c0_1, %c0_2] : memref<8x8x128xf32, #tpu.memory_space<vmem>>, vector<8x8x128xf32>
    %4 = vector.shape_cast %3 : vector<8x8x128xf32> to vector<64x128xf32>
    %5 = arith.truncf %4 : vector<64x128xf32> to vector<64x128xbf16>
    %c0_3 = arith.constant 0 : index
    %c0_4 = arith.constant 0 : index
    %6 = vector.load %arg5[%c0_3, %c0_4] : memref<128x512xbf16, #tpu.memory_space<vmem>>, vector<128x512xbf16>
    %cst = arith.constant dense<0.000000e+00> : vector<64x512xf32>
    %7 = tpu.matmul %5, %6, %cst {dimension_numbers = #tpu.dot_dimension_numbers<[1], [0], [0], [1], [0, 0, 1, 1], [], []>} : vector<64x128xbf16>, vector<128x512xbf16>, vector<64x512xf32> -> vector<64x512xf32>
    %c0_5 = arith.constant 0 : index
    %c0_6 = arith.constant 0 : index
    %8 = vector.load %arg7[%c0_5, %c0_6] : memref<1x512xf32, #tpu.memory_space<vmem>>, vector<1x512xf32>
    %9 = vector.broadcast %8 : vector<1x512xf32> to vector<64x512xf32>
    %10 = arith.addf %7, %9 : vector<64x512xf32>
    %c0_7 = arith.constant 0 : index
    %c0_8 = arith.constant 0 : index
    %11 = vector.load %arg11[%c0_7, %c0_8] : memref<64x512xf32, #tpu.memory_space<vmem>>, vector<64x512xf32>
    tpu.vector_store %arg11[%c0_7, %c0_8], %10 {strides = array<i32>} : memref<64x512xf32, #tpu.memory_space<vmem>>, vector<64x512xf32>,
    %c0_9 = arith.constant 0 : index
    %c0_10 = arith.constant 0 : index
    %12 = vector.load %arg6[%c0_9, %c0_10] : memref<128x512xbf16, #tpu.memory_space<vmem>>, vector<128x512xbf16>
    %c0_i32_11 = arith.constant 0 : i32
    %c0_12 = arith.constant 0 : index
    %c0_13 = arith.constant 0 : index
    %13 = vector.load %arg12[%c0_12, %c0_13] : memref<8x128xf32, #tpu.memory_space<vmem>>, vector<8x128xf32>
    %c0_14 = arith.constant 0 : index
    %c0_15 = arith.constant 0 : index
    %14 = vector.load %arg13[%c0_14, %c0_15] : memref<8x128xf32, #tpu.memory_space<vmem>>, vector<8x128xf32>
    %c8_i32 = arith.constant 8 : i32
    %15 = arith.muli %c0_i32_11, %c8_i32 : i32
    %16 = tpu.assume_multiple %15, 8 : i32
    %17 = arith.index_cast %16 : i32 to index
    %c0_16 = arith.constant 0 : index
    %18 = vector.load %arg11[%17, %c0_16] : memref<64x512xf32, #tpu.memory_space<vmem>>, vector<8x512xf32>
    %19 = arith.truncf %13 : vector<8x128xf32> to vector<8x128xbf16>
    %cst_17 = arith.constant dense<0.000000e+00> : vector<8x512xf32>
    %20 = tpu.matmul %19, %12, %cst_17 {dimension_numbers = #tpu.dot_dimension_numbers<[1], [0], [0], [1], [0, 0, 1, 1], [], []>} : vector<8x128xbf16>, vector<128x512xbf16>, vector<8x512xf32> -> vector<8x512xf32>
    %21 = arith.addf %18, %20 : vector<8x512xf32>
    %22 = vector.extract_strided_slice %21 {offsets = [0, 0], sizes = [8, 128], strides = [1, 1]} : vector<8x512xf32> to vector<8x128xf32>
    %23 = vector.extract_strided_slice %21 {offsets = [0, 128], sizes = [8, 128], strides = [1, 1]} : vector<8x512xf32> to vector<8x128xf32>
    %24 = vector.extract_strided_slice %21 {offsets = [0, 256], sizes = [8, 128], strides = [1, 1]} : vector<8x512xf32> to vector<8x128xf32>
    %25 = vector.extract_strided_slice %21 {offsets = [0, 384], sizes = [8, 128], strides = [1, 1]} : vector<8x512xf32> to vector<8x128xf32>
    %26 = arith.negf %22 : vector<8x128xf32>
    %27 = math.exp %26 : vector<8x128xf32>
    %cst_18 = arith.constant 1.000000e+00 : f32
    %28 = vector.broadcast %cst_18 : f32 to vector<8x128xf32>
    %29 = arith.addf %28, %27 : vector<8x128xf32>
    %30 = arith.divf %28, %29 : vector<8x128xf32>
    %31 = arith.mulf %30, %14 : vector<8x128xf32>
    %32 = arith.negf %23 : vector<8x128xf32>
    %33 = math.exp %32 : vector<8x128xf32>
    %cst_19 = arith.constant 1.000000e+00 : f32
    %34 = vector.broadcast %cst_19 : f32 to vector<8x128xf32>
    %35 = arith.addf %34, %33 : vector<8x128xf32>
    %36 = arith.divf %34, %35 : vector<8x128xf32>
    %37 = math.tanh %25 : vector<8x128xf32>
    %38 = arith.mulf %36, %37 : vector<8x128xf32>
    %39 = arith.addf %31, %38 : vector<8x128xf32>
    %40 = arith.negf %24 : vector<8x128xf32>
    %41 = math.exp %40 : vector<8x128xf32>
    %cst_20 = arith.constant 1.000000e+00 : f32
    %42 = vector.broadcast %cst_20 : f32 to vector<8x128xf32>
    %43 = arith.addf %42, %41 : vector<8x128xf32>
    %44 = arith.divf %42, %43 : vector<8x128xf32>
    %45 = math.tanh %39 : vector<8x128xf32>
    %46 = arith.mulf %44, %45 : vector<8x128xf32>
    %c0_21 = arith.constant 0 : index
    %c0_22 = arith.constant 0 : index
    %47 = vector.load %arg12[%c0_21, %c0_22] : memref<8x128xf32, #tpu.memory_space<vmem>>, vector<8x128xf32>
    tpu.vector_store %arg12[%c0_21, %c0_22], %46 {strides = array<i32>} : memref<8x128xf32, #tpu.memory_space<vmem>>, vector<8x128xf32>,
    %c0_23 = arith.constant 0 : index
    %c0_24 = arith.constant 0 : index
    %48 = vector.load %arg13[%c0_23, %c0_24] : memref<8x128xf32, #tpu.memory_space<vmem>>, vector<8x128xf32>
    tpu.vector_store %arg13[%c0_23, %c0_24], %39 {strides = array<i32>} : memref<8x128xf32, #tpu.memory_space<vmem>>, vector<8x128xf32>,
    %49 = arith.index_cast %c0_i32_11 : i32 to index
    %c0_25 = arith.constant 0 : index
    %c0_26 = arith.constant 0 : index
    %50 = vector.load %arg8[%49, %c0_25, %c0_26] : memref<8x8x128xf32, #tpu.memory_space<vmem>>, vector<1x8x128xf32>
    %51 = vector.shape_cast %50 : vector<1x8x128xf32> to vector<8x128xf32>
    %52 = vector.shape_cast %46 : vector<8x128xf32> to vector<1x8x128xf32>
    tpu.vector_store %arg8[%49, %c0_25, %c0_26], %52 {strides = array<i32>} : memref<8x8x128xf32, #tpu.memory_space<vmem>>, vector<1x8x128xf32>,
    %c1_i32 = arith.constant 1 : i32
    %c0_27 = arith.constant 0 : index
    %c0_28 = arith.constant 0 : index
    %53 = vector.load %arg12[%c0_27, %c0_28] : memref<8x128xf32, #tpu.memory_space<vmem>>, vector<8x128xf32>
    %c0_29 = arith.constant 0 : index
    %c0_30 = arith.constant 0 : index
    %54 = vector.load %arg13[%c0_29, %c0_30] : memref<8x128xf32, #tpu.memory_space<vmem>>, vector<8x128xf32>
    %c8_i32_31 = arith.constant 8 : i32
    %55 = arith.muli %c1_i32, %c8_i32_31 : i32
    %56 = tpu.assume_multiple %55, 8 : i32
    %57 = arith.index_cast %56 : i32 to index
    %c0_32 = arith.constant 0 : index
    %58 = vector.load %arg11[%57, %c0_32] : memref<64x512xf32, #tpu.memory_space<vmem>>, vector<8x512xf32>
    %59 = arith.truncf %53 : vector<8x128xf32> to vector<8x128xbf16>
    %cst_33 = arith.constant dense<0.000000e+00> : vector<8x512xf32>
    %60 = tpu.matmul %59, %12, %cst_33 {dimension_numbers = #tpu.dot_dimension_numbers<[1], [0], [0], [1], [0, 0, 1, 1], [], []>} : vector<8x128xbf16>, vector<128x512xbf16>, vector<8x512xf32> -> vector<8x512xf32>
    %61 = arith.addf %58, %60 : vector<8x512xf32>
    %62 = vector.extract_strided_slice %61 {offsets = [0, 0], sizes = [8, 128], strides = [1, 1]} : vector<8x512xf32> to vector<8x128xf32>
    %63 = vector.extract_strided_slice %61 {offsets = [0, 128], sizes = [8, 128], strides = [1, 1]} : vector<8x512xf32> to vector<8x128xf32>
    %64 = vector.extract_strided_slice %61 {offsets = [0, 256], sizes = [8, 128], strides = [1, 1]} : vector<8x512xf32> to vector<8x128xf32>
    %65 = vector.extract_strided_slice %61 {offsets = [0, 384], sizes = [8, 128], strides = [1, 1]} : vector<8x512xf32> to vector<8x128xf32>
    %66 = arith.negf %62 : vector<8x128xf32>
    %67 = math.exp %66 : vector<8x128xf32>
    %cst_34 = arith.constant 1.000000e+00 : f32
    %68 = vector.broadcast %cst_34 : f32 to vector<8x128xf32>
    %69 = arith.addf %68, %67 : vector<8x128xf32>
    %70 = arith.divf %68, %69 : vector<8x128xf32>
    %71 = arith.mulf %70, %54 : vector<8x128xf32>
    %72 = arith.negf %63 : vector<8x128xf32>
    %73 = math.exp %72 : vector<8x128xf32>
    %cst_35 = arith.constant 1.000000e+00 : f32
    %74 = vector.broadcast %cst_35 : f32 to vector<8x128xf32>
    %75 = arith.addf %74, %73 : vector<8x128xf32>
    %76 = arith.divf %74, %75 : vector<8x128xf32>
    %77 = math.tanh %65 : vector<8x128xf32>
    %78 = arith.mulf %76, %77 : vector<8x128xf32>
    %79 = arith.addf %71, %78 : vector<8x128xf32>
    %80 = arith.negf %64 : vector<8x128xf32>
    %81 = math.exp %80 : vector<8x128xf32>
    %cst_36 = arith.constant 1.000000e+00 : f32
    %82 = vector.broadcast %cst_36 : f32 to vector<8x128xf32>
    %83 = arith.addf %82, %81 : vector<8x128xf32>
    %84 = arith.divf %82, %83 : vector<8x128xf32>
    %85 = math.tanh %79 : vector<8x128xf32>
    %86 = arith.mulf %84, %85 : vector<8x128xf32>
    %c0_37 = arith.constant 0 : index
    %c0_38 = arith.constant 0 : index
    %87 = vector.load %arg12[%c0_37, %c0_38] : memref<8x128xf32, #tpu.memory_space<vmem>>, vector<8x128xf32>
    tpu.vector_store %arg12[%c0_37, %c0_38], %86 {strides = array<i32>} : memref<8x128xf32, #tpu.memory_space<vmem>>, vector<8x128xf32>,
    %c0_39 = arith.constant 0 : index
    %c0_40 = arith.constant 0 : index
    %88 = vector.load %arg13[%c0_39, %c0_40] : memref<8x128xf32, #tpu.memory_space<vmem>>, vector<8x128xf32>
    tpu.vector_store %arg13[%c0_39, %c0_40], %79 {strides = array<i32>} : memref<8x128xf32, #tpu.memory_space<vmem>>, vector<8x128xf32>,
    %89 = arith.index_cast %c1_i32 : i32 to index
    %c0_41 = arith.constant 0 : index
    %c0_42 = arith.constant 0 : index
    %90 = vector.load %arg8[%89, %c0_41, %c0_42] : memref<8x8x128xf32, #tpu.memory_space<vmem>>, vector<1x8x128xf32>
    %91 = vector.shape_cast %90 : vector<1x8x128xf32> to vector<8x128xf32>
    %92 = vector.shape_cast %86 : vector<8x128xf32> to vector<1x8x128xf32>
    tpu.vector_store %arg8[%89, %c0_41, %c0_42], %92 {strides = array<i32>} : memref<8x8x128xf32, #tpu.memory_space<vmem>>, vector<1x8x128xf32>,
    %c2_i32 = arith.constant 2 : i32
    %c0_43 = arith.constant 0 : index
    %c0_44 = arith.constant 0 : index
    %93 = vector.load %arg12[%c0_43, %c0_44] : memref<8x128xf32, #tpu.memory_space<vmem>>, vector<8x128xf32>
    %c0_45 = arith.constant 0 : index
    %c0_46 = arith.constant 0 : index
    %94 = vector.load %arg13[%c0_45, %c0_46] : memref<8x128xf32, #tpu.memory_space<vmem>>, vector<8x128xf32>
    %c8_i32_47 = arith.constant 8 : i32
    %95 = arith.muli %c2_i32, %c8_i32_47 : i32
    %96 = tpu.assume_multiple %95, 8 : i32
    %97 = arith.index_cast %96 : i32 to index
    %c0_48 = arith.constant 0 : index
    %98 = vector.load %arg11[%97, %c0_48] : memref<64x512xf32, #tpu.memory_space<vmem>>, vector<8x512xf32>
    %99 = arith.truncf %93 : vector<8x128xf32> to vector<8x128xbf16>
    %cst_49 = arith.constant dense<0.000000e+00> : vector<8x512xf32>
    %100 = tpu.matmul %99, %12, %cst_49 {dimension_numbers = #tpu.dot_dimension_numbers<[1], [0], [0], [1], [0, 0, 1, 1], [], []>} : vector<8x128xbf16>, vector<128x512xbf16>, vector<8x512xf32> -> vector<8x512xf32>
    %101 = arith.addf %98, %100 : vector<8x512xf32>
    %102 = vector.extract_strided_slice %101 {offsets = [0, 0], sizes = [8, 128], strides = [1, 1]} : vector<8x512xf32> to vector<8x128xf32>
    %103 = vector.extract_strided_slice %101 {offsets = [0, 128], sizes = [8, 128], strides = [1, 1]} : vector<8x512xf32> to vector<8x128xf32>
    %104 = vector.extract_strided_slice %101 {offsets = [0, 256], sizes = [8, 128], strides = [1, 1]} : vector<8x512xf32> to vector<8x128xf32>
    %105 = vector.extract_strided_slice %101 {offsets = [0, 384], sizes = [8, 128], strides = [1, 1]} : vector<8x512xf32> to vector<8x128xf32>
    %106 = arith.negf %102 : vector<8x128xf32>
    %107 = math.exp %106 : vector<8x128xf32>
    %cst_50 = arith.constant 1.000000e+00 : f32
    %108 = vector.broadcast %cst_50 : f32 to vector<8x128xf32>
    %109 = arith.addf %108, %107 : vector<8x128xf32>
    %110 = arith.divf %108, %109 : vector<8x128xf32>
    %111 = arith.mulf %110, %94 : vector<8x128xf32>
    %112 = arith.negf %103 : vector<8x128xf32>
    %113 = math.exp %112 : vector<8x128xf32>
    %cst_51 = arith.constant 1.000000e+00 : f32
    %114 = vector.broadcast %cst_51 : f32 to vector<8x128xf32>
    %115 = arith.addf %114, %113 : vector<8x128xf32>
    %116 = arith.divf %114, %115 : vector<8x128xf32>
    %117 = math.tanh %105 : vector<8x128xf32>
    %118 = arith.mulf %116, %117 : vector<8x128xf32>
    %119 = arith.addf %111, %118 : vector<8x128xf32>
    %120 = arith.negf %104 : vector<8x128xf32>
    %121 = math.exp %120 : vector<8x128xf32>
    %cst_52 = arith.constant 1.000000e+00 : f32
    %122 = vector.broadcast %cst_52 : f32 to vector<8x128xf32>
    %123 = arith.addf %122, %121 : vector<8x128xf32>
    %124 = arith.divf %122, %123 : vector<8x128xf32>
    %125 = math.tanh %119 : vector<8x128xf32>
    %126 = arith.mulf %124, %125 : vector<8x128xf32>
    %c0_53 = arith.constant 0 : index
    %c0_54 = arith.constant 0 : index
    %127 = vector.load %arg12[%c0_53, %c0_54] : memref<8x128xf32, #tpu.memory_space<vmem>>, vector<8x128xf32>
    tpu.vector_store %arg12[%c0_53, %c0_54], %126 {strides = array<i32>} : memref<8x128xf32, #tpu.memory_space<vmem>>, vector<8x128xf32>,
    %c0_55 = arith.constant 0 : index
    %c0_56 = arith.constant 0 : index
    %128 = vector.load %arg13[%c0_55, %c0_56] : memref<8x128xf32, #tpu.memory_space<vmem>>, vector<8x128xf32>
    tpu.vector_store %arg13[%c0_55, %c0_56], %119 {strides = array<i32>} : memref<8x128xf32, #tpu.memory_space<vmem>>, vector<8x128xf32>,
    %129 = arith.index_cast %c2_i32 : i32 to index
    %c0_57 = arith.constant 0 : index
    %c0_58 = arith.constant 0 : index
    %130 = vector.load %arg8[%129, %c0_57, %c0_58] : memref<8x8x128xf32, #tpu.memory_space<vmem>>, vector<1x8x128xf32>
    %131 = vector.shape_cast %130 : vector<1x8x128xf32> to vector<8x128xf32>
    %132 = vector.shape_cast %126 : vector<8x128xf32> to vector<1x8x128xf32>
    tpu.vector_store %arg8[%129, %c0_57, %c0_58], %132 {strides = array<i32>} : memref<8x8x128xf32, #tpu.memory_space<vmem>>, vector<1x8x128xf32>,
    %c3_i32 = arith.constant 3 : i32
    %c0_59 = arith.constant 0 : index
    %c0_60 = arith.constant 0 : index
    %133 = vector.load %arg12[%c0_59, %c0_60] : memref<8x128xf32, #tpu.memory_space<vmem>>, vector<8x128xf32>
    %c0_61 = arith.constant 0 : index
    %c0_62 = arith.constant 0 : index
    %134 = vector.load %arg13[%c0_61, %c0_62] : memref<8x128xf32, #tpu.memory_space<vmem>>, vector<8x128xf32>
    %c8_i32_63 = arith.constant 8 : i32
    %135 = arith.muli %c3_i32, %c8_i32_63 : i32
    %136 = tpu.assume_multiple %135, 8 : i32
    %137 = arith.index_cast %136 : i32 to index
    %c0_64 = arith.constant 0 : index
    %138 = vector.load %arg11[%137, %c0_64] : memref<64x512xf32, #tpu.memory_space<vmem>>, vector<8x512xf32>
    %139 = arith.truncf %133 : vector<8x128xf32> to vector<8x128xbf16>
    %cst_65 = arith.constant dense<0.000000e+00> : vector<8x512xf32>
    %140 = tpu.matmul %139, %12, %cst_65 {dimension_numbers = #tpu.dot_dimension_numbers<[1], [0], [0], [1], [0, 0, 1, 1], [], []>} : vector<8x128xbf16>, vector<128x512xbf16>, vector<8x512xf32> -> vector<8x512xf32>
    %141 = arith.addf %138, %140 : vector<8x512xf32>
    %142 = vector.extract_strided_slice %141 {offsets = [0, 0], sizes = [8, 128], strides = [1, 1]} : vector<8x512xf32> to vector<8x128xf32>
    %143 = vector.extract_strided_slice %141 {offsets = [0, 128], sizes = [8, 128], strides = [1, 1]} : vector<8x512xf32> to vector<8x128xf32>
    %144 = vector.extract_strided_slice %141 {offsets = [0, 256], sizes = [8, 128], strides = [1, 1]} : vector<8x512xf32> to vector<8x128xf32>
    %145 = vector.extract_strided_slice %141 {offsets = [0, 384], sizes = [8, 128], strides = [1, 1]} : vector<8x512xf32> to vector<8x128xf32>
    %146 = arith.negf %142 : vector<8x128xf32>
    %147 = math.exp %146 : vector<8x128xf32>
    %cst_66 = arith.constant 1.000000e+00 : f32
    %148 = vector.broadcast %cst_66 : f32 to vector<8x128xf32>
    %149 = arith.addf %148, %147 : vector<8x128xf32>
    %150 = arith.divf %148, %149 : vector<8x128xf32>
    %151 = arith.mulf %150, %134 : vector<8x128xf32>
    %152 = arith.negf %143 : vector<8x128xf32>
    %153 = math.exp %152 : vector<8x128xf32>
    %cst_67 = arith.constant 1.000000e+00 : f32
    %154 = vector.broadcast %cst_67 : f32 to vector<8x128xf32>
    %155 = arith.addf %154, %153 : vector<8x128xf32>
    %156 = arith.divf %154, %155 : vector<8x128xf32>
    %157 = math.tanh %145 : vector<8x128xf32>
    %158 = arith.mulf %156, %157 : vector<8x128xf32>
    %159 = arith.addf %151, %158 : vector<8x128xf32>
    %160 = arith.negf %144 : vector<8x128xf32>
    %161 = math.exp %160 : vector<8x128xf32>
    %cst_68 = arith.constant 1.000000e+00 : f32
    %162 = vector.broadcast %cst_68 : f32 to vector<8x128xf32>
    %163 = arith.addf %162, %161 : vector<8x128xf32>
    %164 = arith.divf %162, %163 : vector<8x128xf32>
    %165 = math.tanh %159 : vector<8x128xf32>
    %166 = arith.mulf %164, %165 : vector<8x128xf32>
    %c0_69 = arith.constant 0 : index
    %c0_70 = arith.constant 0 : index
    %167 = vector.load %arg12[%c0_69, %c0_70] : memref<8x128xf32, #tpu.memory_space<vmem>>, vector<8x128xf32>
    tpu.vector_store %arg12[%c0_69, %c0_70], %166 {strides = array<i32>} : memref<8x128xf32, #tpu.memory_space<vmem>>, vector<8x128xf32>,
    %c0_71 = arith.constant 0 : index
    %c0_72 = arith.constant 0 : index
    %168 = vector.load %arg13[%c0_71, %c0_72] : memref<8x128xf32, #tpu.memory_space<vmem>>, vector<8x128xf32>
    tpu.vector_store %arg13[%c0_71, %c0_72], %159 {strides = array<i32>} : memref<8x128xf32, #tpu.memory_space<vmem>>, vector<8x128xf32>,
    %169 = arith.index_cast %c3_i32 : i32 to index
    %c0_73 = arith.constant 0 : index
    %c0_74 = arith.constant 0 : index
    %170 = vector.load %arg8[%169, %c0_73, %c0_74] : memref<8x8x128xf32, #tpu.memory_space<vmem>>, vector<1x8x128xf32>
    %171 = vector.shape_cast %170 : vector<1x8x128xf32> to vector<8x128xf32>
    %172 = vector.shape_cast %166 : vector<8x128xf32> to vector<1x8x128xf32>
    tpu.vector_store %arg8[%169, %c0_73, %c0_74], %172 {strides = array<i32>} : memref<8x8x128xf32, #tpu.memory_space<vmem>>, vector<1x8x128xf32>,
    %c4_i32 = arith.constant 4 : i32
    %c0_75 = arith.constant 0 : index
    %c0_76 = arith.constant 0 : index
    %173 = vector.load %arg12[%c0_75, %c0_76] : memref<8x128xf32, #tpu.memory_space<vmem>>, vector<8x128xf32>
    %c0_77 = arith.constant 0 : index
    %c0_78 = arith.constant 0 : index
    %174 = vector.load %arg13[%c0_77, %c0_78] : memref<8x128xf32, #tpu.memory_space<vmem>>, vector<8x128xf32>
    %c8_i32_79 = arith.constant 8 : i32
    %175 = arith.muli %c4_i32, %c8_i32_79 : i32
    %176 = tpu.assume_multiple %175, 8 : i32
    %177 = arith.index_cast %176 : i32 to index
    %c0_80 = arith.constant 0 : index
    %178 = vector.load %arg11[%177, %c0_80] : memref<64x512xf32, #tpu.memory_space<vmem>>, vector<8x512xf32>
    %179 = arith.truncf %173 : vector<8x128xf32> to vector<8x128xbf16>
    %cst_81 = arith.constant dense<0.000000e+00> : vector<8x512xf32>
    %180 = tpu.matmul %179, %12, %cst_81 {dimension_numbers = #tpu.dot_dimension_numbers<[1], [0], [0], [1], [0, 0, 1, 1], [], []>} : vector<8x128xbf16>, vector<128x512xbf16>, vector<8x512xf32> -> vector<8x512xf32>
    %181 = arith.addf %178, %180 : vector<8x512xf32>
    %182 = vector.extract_strided_slice %181 {offsets = [0, 0], sizes = [8, 128], strides = [1, 1]} : vector<8x512xf32> to vector<8x128xf32>
    %183 = vector.extract_strided_slice %181 {offsets = [0, 128], sizes = [8, 128], strides = [1, 1]} : vector<8x512xf32> to vector<8x128xf32>
    %184 = vector.extract_strided_slice %181 {offsets = [0, 256], sizes = [8, 128], strides = [1, 1]} : vector<8x512xf32> to vector<8x128xf32>
    %185 = vector.extract_strided_slice %181 {offsets = [0, 384], sizes = [8, 128], strides = [1, 1]} : vector<8x512xf32> to vector<8x128xf32>
    %186 = arith.negf %182 : vector<8x128xf32>
    %187 = math.exp %186 : vector<8x128xf32>
    %cst_82 = arith.constant 1.000000e+00 : f32
    %188 = vector.broadcast %cst_82 : f32 to vector<8x128xf32>
    %189 = arith.addf %188, %187 : vector<8x128xf32>
    %190 = arith.divf %188, %189 : vector<8x128xf32>
    %191 = arith.mulf %190, %174 : vector<8x128xf32>
    %192 = arith.negf %183 : vector<8x128xf32>
    %193 = math.exp %192 : vector<8x128xf32>
    %cst_83 = arith.constant 1.000000e+00 : f32
    %194 = vector.broadcast %cst_83 : f32 to vector<8x128xf32>
    %195 = arith.addf %194, %193 : vector<8x128xf32>
    %196 = arith.divf %194, %195 : vector<8x128xf32>
    %197 = math.tanh %185 : vector<8x128xf32>
    %198 = arith.mulf %196, %197 : vector<8x128xf32>
    %199 = arith.addf %191, %198 : vector<8x128xf32>
    %200 = arith.negf %184 : vector<8x128xf32>
    %201 = math.exp %200 : vector<8x128xf32>
    %cst_84 = arith.constant 1.000000e+00 : f32
    %202 = vector.broadcast %cst_84 : f32 to vector<8x128xf32>
    %203 = arith.addf %202, %201 : vector<8x128xf32>
    %204 = arith.divf %202, %203 : vector<8x128xf32>
    %205 = math.tanh %199 : vector<8x128xf32>
    %206 = arith.mulf %204, %205 : vector<8x128xf32>
    %c0_85 = arith.constant 0 : index
    %c0_86 = arith.constant 0 : index
    %207 = vector.load %arg12[%c0_85, %c0_86] : memref<8x128xf32, #tpu.memory_space<vmem>>, vector<8x128xf32>
    tpu.vector_store %arg12[%c0_85, %c0_86], %206 {strides = array<i32>} : memref<8x128xf32, #tpu.memory_space<vmem>>, vector<8x128xf32>,
    %c0_87 = arith.constant 0 : index
    %c0_88 = arith.constant 0 : index
    %208 = vector.load %arg13[%c0_87, %c0_88] : memref<8x128xf32, #tpu.memory_space<vmem>>, vector<8x128xf32>
    tpu.vector_store %arg13[%c0_87, %c0_88], %199 {strides = array<i32>} : memref<8x128xf32, #tpu.memory_space<vmem>>, vector<8x128xf32>,
    %209 = arith.index_cast %c4_i32 : i32 to index
    %c0_89 = arith.constant 0 : index
    %c0_90 = arith.constant 0 : index
    %210 = vector.load %arg8[%209, %c0_89, %c0_90] : memref<8x8x128xf32, #tpu.memory_space<vmem>>, vector<1x8x128xf32>
    %211 = vector.shape_cast %210 : vector<1x8x128xf32> to vector<8x128xf32>
    %212 = vector.shape_cast %206 : vector<8x128xf32> to vector<1x8x128xf32>
    tpu.vector_store %arg8[%209, %c0_89, %c0_90], %212 {strides = array<i32>} : memref<8x8x128xf32, #tpu.memory_space<vmem>>, vector<1x8x128xf32>,
    %c5_i32 = arith.constant 5 : i32
    %c0_91 = arith.constant 0 : index
    %c0_92 = arith.constant 0 : index
    %213 = vector.load %arg12[%c0_91, %c0_92] : memref<8x128xf32, #tpu.memory_space<vmem>>, vector<8x128xf32>
    %c0_93 = arith.constant 0 : index
    %c0_94 = arith.constant 0 : index
    %214 = vector.load %arg13[%c0_93, %c0_94] : memref<8x128xf32, #tpu.memory_space<vmem>>, vector<8x128xf32>
    %c8_i32_95 = arith.constant 8 : i32
    %215 = arith.muli %c5_i32, %c8_i32_95 : i32
    %216 = tpu.assume_multiple %215, 8 : i32
    %217 = arith.index_cast %216 : i32 to index
    %c0_96 = arith.constant 0 : index
    %218 = vector.load %arg11[%217, %c0_96] : memref<64x512xf32, #tpu.memory_space<vmem>>, vector<8x512xf32>
    %219 = arith.truncf %213 : vector<8x128xf32> to vector<8x128xbf16>
    %cst_97 = arith.constant dense<0.000000e+00> : vector<8x512xf32>
    %220 = tpu.matmul %219, %12, %cst_97 {dimension_numbers = #tpu.dot_dimension_numbers<[1], [0], [0], [1], [0, 0, 1, 1], [], []>} : vector<8x128xbf16>, vector<128x512xbf16>, vector<8x512xf32> -> vector<8x512xf32>
    %221 = arith.addf %218, %220 : vector<8x512xf32>
    %222 = vector.extract_strided_slice %221 {offsets = [0, 0], sizes = [8, 128], strides = [1, 1]} : vector<8x512xf32> to vector<8x128xf32>
    %223 = vector.extract_strided_slice %221 {offsets = [0, 128], sizes = [8, 128], strides = [1, 1]} : vector<8x512xf32> to vector<8x128xf32>
    %224 = vector.extract_strided_slice %221 {offsets = [0, 256], sizes = [8, 128], strides = [1, 1]} : vector<8x512xf32> to vector<8x128xf32>
    %225 = vector.extract_strided_slice %221 {offsets = [0, 384], sizes = [8, 128], strides = [1, 1]} : vector<8x512xf32> to vector<8x128xf32>
    %226 = arith.negf %222 : vector<8x128xf32>
    %227 = math.exp %226 : vector<8x128xf32>
    %cst_98 = arith.constant 1.000000e+00 : f32
    %228 = vector.broadcast %cst_98 : f32 to vector<8x128xf32>
    %229 = arith.addf %228, %227 : vector<8x128xf32>
    %230 = arith.divf %228, %229 : vector<8x128xf32>
    %231 = arith.mulf %230, %214 : vector<8x128xf32>
    %232 = arith.negf %223 : vector<8x128xf32>
    %233 = math.exp %232 : vector<8x128xf32>
    %cst_99 = arith.constant 1.000000e+00 : f32
    %234 = vector.broadcast %cst_99 : f32 to vector<8x128xf32>
    %235 = arith.addf %234, %233 : vector<8x128xf32>
    %236 = arith.divf %234, %235 : vector<8x128xf32>
    %237 = math.tanh %225 : vector<8x128xf32>
    %238 = arith.mulf %236, %237 : vector<8x128xf32>
    %239 = arith.addf %231, %238 : vector<8x128xf32>
    %240 = arith.negf %224 : vector<8x128xf32>
    %241 = math.exp %240 : vector<8x128xf32>
    %cst_100 = arith.constant 1.000000e+00 : f32
    %242 = vector.broadcast %cst_100 : f32 to vector<8x128xf32>
    %243 = arith.addf %242, %241 : vector<8x128xf32>
    %244 = arith.divf %242, %243 : vector<8x128xf32>
    %245 = math.tanh %239 : vector<8x128xf32>
    %246 = arith.mulf %244, %245 : vector<8x128xf32>
    %c0_101 = arith.constant 0 : index
    %c0_102 = arith.constant 0 : index
    %247 = vector.load %arg12[%c0_101, %c0_102] : memref<8x128xf32, #tpu.memory_space<vmem>>, vector<8x128xf32>
    tpu.vector_store %arg12[%c0_101, %c0_102], %246 {strides = array<i32>} : memref<8x128xf32, #tpu.memory_space<vmem>>, vector<8x128xf32>,
    %c0_103 = arith.constant 0 : index
    %c0_104 = arith.constant 0 : index
    %248 = vector.load %arg13[%c0_103, %c0_104] : memref<8x128xf32, #tpu.memory_space<vmem>>, vector<8x128xf32>
    tpu.vector_store %arg13[%c0_103, %c0_104], %239 {strides = array<i32>} : memref<8x128xf32, #tpu.memory_space<vmem>>, vector<8x128xf32>,
    %249 = arith.index_cast %c5_i32 : i32 to index
    %c0_105 = arith.constant 0 : index
    %c0_106 = arith.constant 0 : index
    %250 = vector.load %arg8[%249, %c0_105, %c0_106] : memref<8x8x128xf32, #tpu.memory_space<vmem>>, vector<1x8x128xf32>
    %251 = vector.shape_cast %250 : vector<1x8x128xf32> to vector<8x128xf32>
    %252 = vector.shape_cast %246 : vector<8x128xf32> to vector<1x8x128xf32>
    tpu.vector_store %arg8[%249, %c0_105, %c0_106], %252 {strides = array<i32>} : memref<8x8x128xf32, #tpu.memory_space<vmem>>, vector<1x8x128xf32>,
    %c6_i32 = arith.constant 6 : i32
    %c0_107 = arith.constant 0 : index
    %c0_108 = arith.constant 0 : index
    %253 = vector.load %arg12[%c0_107, %c0_108] : memref<8x128xf32, #tpu.memory_space<vmem>>, vector<8x128xf32>
    %c0_109 = arith.constant 0 : index
    %c0_110 = arith.constant 0 : index
    %254 = vector.load %arg13[%c0_109, %c0_110] : memref<8x128xf32, #tpu.memory_space<vmem>>, vector<8x128xf32>
    %c8_i32_111 = arith.constant 8 : i32
    %255 = arith.muli %c6_i32, %c8_i32_111 : i32
    %256 = tpu.assume_multiple %255, 8 : i32
    %257 = arith.index_cast %256 : i32 to index
    %c0_112 = arith.constant 0 : index
    %258 = vector.load %arg11[%257, %c0_112] : memref<64x512xf32, #tpu.memory_space<vmem>>, vector<8x512xf32>
    %259 = arith.truncf %253 : vector<8x128xf32> to vector<8x128xbf16>
    %cst_113 = arith.constant dense<0.000000e+00> : vector<8x512xf32>
    %260 = tpu.matmul %259, %12, %cst_113 {dimension_numbers = #tpu.dot_dimension_numbers<[1], [0], [0], [1], [0, 0, 1, 1], [], []>} : vector<8x128xbf16>, vector<128x512xbf16>, vector<8x512xf32> -> vector<8x512xf32>
    %261 = arith.addf %258, %260 : vector<8x512xf32>
    %262 = vector.extract_strided_slice %261 {offsets = [0, 0], sizes = [8, 128], strides = [1, 1]} : vector<8x512xf32> to vector<8x128xf32>
    %263 = vector.extract_strided_slice %261 {offsets = [0, 128], sizes = [8, 128], strides = [1, 1]} : vector<8x512xf32> to vector<8x128xf32>
    %264 = vector.extract_strided_slice %261 {offsets = [0, 256], sizes = [8, 128], strides = [1, 1]} : vector<8x512xf32> to vector<8x128xf32>
    %265 = vector.extract_strided_slice %261 {offsets = [0, 384], sizes = [8, 128], strides = [1, 1]} : vector<8x512xf32> to vector<8x128xf32>
    %266 = arith.negf %262 : vector<8x128xf32>
    %267 = math.exp %266 : vector<8x128xf32>
    %cst_114 = arith.constant 1.000000e+00 : f32
    %268 = vector.broadcast %cst_114 : f32 to vector<8x128xf32>
    %269 = arith.addf %268, %267 : vector<8x128xf32>
    %270 = arith.divf %268, %269 : vector<8x128xf32>
    %271 = arith.mulf %270, %254 : vector<8x128xf32>
    %272 = arith.negf %263 : vector<8x128xf32>
    %273 = math.exp %272 : vector<8x128xf32>
    %cst_115 = arith.constant 1.000000e+00 : f32
    %274 = vector.broadcast %cst_115 : f32 to vector<8x128xf32>
    %275 = arith.addf %274, %273 : vector<8x128xf32>
    %276 = arith.divf %274, %275 : vector<8x128xf32>
    %277 = math.tanh %265 : vector<8x128xf32>
    %278 = arith.mulf %276, %277 : vector<8x128xf32>
    %279 = arith.addf %271, %278 : vector<8x128xf32>
    %280 = arith.negf %264 : vector<8x128xf32>
    %281 = math.exp %280 : vector<8x128xf32>
    %cst_116 = arith.constant 1.000000e+00 : f32
    %282 = vector.broadcast %cst_116 : f32 to vector<8x128xf32>
    %283 = arith.addf %282, %281 : vector<8x128xf32>
    %284 = arith.divf %282, %283 : vector<8x128xf32>
    %285 = math.tanh %279 : vector<8x128xf32>
    %286 = arith.mulf %284, %285 : vector<8x128xf32>
    %c0_117 = arith.constant 0 : index
    %c0_118 = arith.constant 0 : index
    %287 = vector.load %arg12[%c0_117, %c0_118] : memref<8x128xf32, #tpu.memory_space<vmem>>, vector<8x128xf32>
    tpu.vector_store %arg12[%c0_117, %c0_118], %286 {strides = array<i32>} : memref<8x128xf32, #tpu.memory_space<vmem>>, vector<8x128xf32>,
    %c0_119 = arith.constant 0 : index
    %c0_120 = arith.constant 0 : index
    %288 = vector.load %arg13[%c0_119, %c0_120] : memref<8x128xf32, #tpu.memory_space<vmem>>, vector<8x128xf32>
    tpu.vector_store %arg13[%c0_119, %c0_120], %279 {strides = array<i32>} : memref<8x128xf32, #tpu.memory_space<vmem>>, vector<8x128xf32>,
    %289 = arith.index_cast %c6_i32 : i32 to index
    %c0_121 = arith.constant 0 : index
    %c0_122 = arith.constant 0 : index
    %290 = vector.load %arg8[%289, %c0_121, %c0_122] : memref<8x8x128xf32, #tpu.memory_space<vmem>>, vector<1x8x128xf32>
    %291 = vector.shape_cast %290 : vector<1x8x128xf32> to vector<8x128xf32>
    %292 = vector.shape_cast %286 : vector<8x128xf32> to vector<1x8x128xf32>
    tpu.vector_store %arg8[%289, %c0_121, %c0_122], %292 {strides = array<i32>} : memref<8x8x128xf32, #tpu.memory_space<vmem>>, vector<1x8x128xf32>,
    %c7_i32 = arith.constant 7 : i32
    %c0_123 = arith.constant 0 : index
    %c0_124 = arith.constant 0 : index
    %293 = vector.load %arg12[%c0_123, %c0_124] : memref<8x128xf32, #tpu.memory_space<vmem>>, vector<8x128xf32>
    %c0_125 = arith.constant 0 : index
    %c0_126 = arith.constant 0 : index
    %294 = vector.load %arg13[%c0_125, %c0_126] : memref<8x128xf32, #tpu.memory_space<vmem>>, vector<8x128xf32>
    %c8_i32_127 = arith.constant 8 : i32
    %295 = arith.muli %c7_i32, %c8_i32_127 : i32
    %296 = tpu.assume_multiple %295, 8 : i32
    %297 = arith.index_cast %296 : i32 to index
    %c0_128 = arith.constant 0 : index
    %298 = vector.load %arg11[%297, %c0_128] : memref<64x512xf32, #tpu.memory_space<vmem>>, vector<8x512xf32>
    %299 = arith.truncf %293 : vector<8x128xf32> to vector<8x128xbf16>
    %cst_129 = arith.constant dense<0.000000e+00> : vector<8x512xf32>
    %300 = tpu.matmul %299, %12, %cst_129 {dimension_numbers = #tpu.dot_dimension_numbers<[1], [0], [0], [1], [0, 0, 1, 1], [], []>} : vector<8x128xbf16>, vector<128x512xbf16>, vector<8x512xf32> -> vector<8x512xf32>
    %301 = arith.addf %298, %300 : vector<8x512xf32>
    %302 = vector.extract_strided_slice %301 {offsets = [0, 0], sizes = [8, 128], strides = [1, 1]} : vector<8x512xf32> to vector<8x128xf32>
    %303 = vector.extract_strided_slice %301 {offsets = [0, 128], sizes = [8, 128], strides = [1, 1]} : vector<8x512xf32> to vector<8x128xf32>
    %304 = vector.extract_strided_slice %301 {offsets = [0, 256], sizes = [8, 128], strides = [1, 1]} : vector<8x512xf32> to vector<8x128xf32>
    %305 = vector.extract_strided_slice %301 {offsets = [0, 384], sizes = [8, 128], strides = [1, 1]} : vector<8x512xf32> to vector<8x128xf32>
    %306 = arith.negf %302 : vector<8x128xf32>
    %307 = math.exp %306 : vector<8x128xf32>
    %cst_130 = arith.constant 1.000000e+00 : f32
    %308 = vector.broadcast %cst_130 : f32 to vector<8x128xf32>
    %309 = arith.addf %308, %307 : vector<8x128xf32>
    %310 = arith.divf %308, %309 : vector<8x128xf32>
    %311 = arith.mulf %310, %294 : vector<8x128xf32>
    %312 = arith.negf %303 : vector<8x128xf32>
    %313 = math.exp %312 : vector<8x128xf32>
    %cst_131 = arith.constant 1.000000e+00 : f32
    %314 = vector.broadcast %cst_131 : f32 to vector<8x128xf32>
    %315 = arith.addf %314, %313 : vector<8x128xf32>
    %316 = arith.divf %314, %315 : vector<8x128xf32>
    %317 = math.tanh %305 : vector<8x128xf32>
    %318 = arith.mulf %316, %317 : vector<8x128xf32>
    %319 = arith.addf %311, %318 : vector<8x128xf32>
    %320 = arith.negf %304 : vector<8x128xf32>
    %321 = math.exp %320 : vector<8x128xf32>
    %cst_132 = arith.constant 1.000000e+00 : f32
    %322 = vector.broadcast %cst_132 : f32 to vector<8x128xf32>
    %323 = arith.addf %322, %321 : vector<8x128xf32>
    %324 = arith.divf %322, %323 : vector<8x128xf32>
    %325 = math.tanh %319 : vector<8x128xf32>
    %326 = arith.mulf %324, %325 : vector<8x128xf32>
    %c0_133 = arith.constant 0 : index
    %c0_134 = arith.constant 0 : index
    %327 = vector.load %arg12[%c0_133, %c0_134] : memref<8x128xf32, #tpu.memory_space<vmem>>, vector<8x128xf32>
    tpu.vector_store %arg12[%c0_133, %c0_134], %326 {strides = array<i32>} : memref<8x128xf32, #tpu.memory_space<vmem>>, vector<8x128xf32>,
    %c0_135 = arith.constant 0 : index
    %c0_136 = arith.constant 0 : index
    %328 = vector.load %arg13[%c0_135, %c0_136] : memref<8x128xf32, #tpu.memory_space<vmem>>, vector<8x128xf32>
    tpu.vector_store %arg13[%c0_135, %c0_136], %319 {strides = array<i32>} : memref<8x128xf32, #tpu.memory_space<vmem>>, vector<8x128xf32>,
    %329 = arith.index_cast %c7_i32 : i32 to index
    %c0_137 = arith.constant 0 : index
    %c0_138 = arith.constant 0 : index
    %330 = vector.load %arg8[%329, %c0_137, %c0_138] : memref<8x8x128xf32, #tpu.memory_space<vmem>>, vector<1x8x128xf32>
    %331 = vector.shape_cast %330 : vector<1x8x128xf32> to vector<8x128xf32>
    %332 = vector.shape_cast %326 : vector<8x128xf32> to vector<1x8x128xf32>
    tpu.vector_store %arg8[%329, %c0_137, %c0_138], %332 {strides = array<i32>} : memref<8x8x128xf32, #tpu.memory_space<vmem>>, vector<1x8x128xf32>,
    %c8_i32_139 = arith.constant 8 : i32
    %c0_i32_140 = arith.constant 0 : i32
    %333 = arith.cmpi eq, %arg1, %c0_i32_140 : i32
    %334 = arith.extui %333 : i1 to i32
    %c0_i32_141 = arith.constant 0 : i32
    %335 = arith.cmpi ne, %334, %c0_i32_141 : i32
    scf.if %335 {
      %c0_142 = arith.constant 0 : index
      %c0_143 = arith.constant 0 : index
      %336 = vector.load %arg12[%c0_142, %c0_143] : memref<8x128xf32, #tpu.memory_space<vmem>>, vector<8x128xf32>
      %c0_144 = arith.constant 0 : index
      %c0_145 = arith.constant 0 : index
      %337 = vector.load %arg9[%c0_144, %c0_145] : memref<8x128xf32, #tpu.memory_space<vmem>>, vector<8x128xf32>
      tpu.vector_store %arg9[%c0_144, %c0_145], %336 {strides = array<i32>} : memref<8x128xf32, #tpu.memory_space<vmem>>, vector<8x128xf32>,
      %c0_146 = arith.constant 0 : index
      %c0_147 = arith.constant 0 : index
      %338 = vector.load %arg13[%c0_146, %c0_147] : memref<8x128xf32, #tpu.memory_space<vmem>>, vector<8x128xf32>
      %c0_148 = arith.constant 0 : index
      %c0_149 = arith.constant 0 : index
      %339 = vector.load %arg10[%c0_148, %c0_149] : memref<8x128xf32, #tpu.memory_space<vmem>>, vector<8x128xf32>
      tpu.vector_store %arg10[%c0_148, %c0_149], %338 {strides = array<i32>} : memref<8x128xf32, #tpu.memory_space<vmem>>, vector<8x128xf32>,
    } else {
    }
    return
  }
  func.func @transform_0(%arg0: i32, %arg1: i32) -> (i32, i32, i32) {
    %c0_i32 = arith.constant 0 : i32
    %c0_i32_0 = arith.constant 0 : i32
    return %arg1, %arg0, %c0_i32 : i32, i32, i32
  }
  func.func @transform_1(%arg0: i32, %arg1: i32) -> (i32, i32) {
    %c0_i32 = arith.constant 0 : i32
    %c0_i32_0 = arith.constant 0 : i32
    return %arg0, %c0_i32 : i32, i32
  }
  func.func @transform_2(%arg0: i32, %arg1: i32) -> (i32, i32) {
    %c0_i32 = arith.constant 0 : i32
    %c0_i32_0 = arith.constant 0 : i32
    return %arg0, %c0_i32 : i32, i32
  }
  func.func @transform_3(%arg0: i32, %arg1: i32) -> (i32, i32) {
    %c0_i32 = arith.constant 0 : i32
    %c0_i32_0 = arith.constant 0 : i32
    %c0_i32_1 = arith.constant 0 : i32
    return %c0_i32, %c0_i32_0 : i32, i32
  }
  func.func @transform_4(%arg0: i32, %arg1: i32) -> (i32, i32) {
    %c0_i32 = arith.constant 0 : i32
    %c0_i32_0 = arith.constant 0 : i32
    %c0_i32_1 = arith.constant 0 : i32
    return %c0_i32, %c0_i32_0 : i32, i32
  }
  func.func @transform_5(%arg0: i32, %arg1: i32) -> (i32, i32) {
    %c0_i32 = arith.constant 0 : i32
    %c0_i32_0 = arith.constant 0 : i32
    %c0_i32_1 = arith.constant 0 : i32
    return %c0_i32, %c0_i32_0 : i32, i32
  }
  func.func @transform_6(%arg0: i32, %arg1: i32) -> (i32, i32, i32) {
    %c0_i32 = arith.constant 0 : i32
    %c0_i32_0 = arith.constant 0 : i32
    return %arg1, %arg0, %c0_i32 : i32, i32, i32
  }
  func.func @transform_7(%arg0: i32, %arg1: i32) -> (i32, i32) {
    %c0_i32 = arith.constant 0 : i32
    %c0_i32_0 = arith.constant 0 : i32
    return %arg0, %c0_i32 : i32, i32
  }
  func.func @transform_8(%arg0: i32, %arg1: i32) -> (i32, i32) {
    %c0_i32 = arith.constant 0 : i32
    %c0_i32_0 = arith.constant 0 : i32
    return %arg0, %c0_i32 : i32, i32
  }
}

</mosaic_0001>

<bundles_post_ra>
// kernel: tpu_custom_call.1
= control target key start
LH: loop header
LB: loop body
LE: loop exit
PB: predicated region body
PF: predicated region fallthrough
CT: control target
= control target key end

     0   :  { %14 = vsyncpa [#allocation6], 0  ;;  %s2999_s0 = inlined_call_operand.hbm [shape: f32[8,8,128], index: 0, kind: input, shape index: {}]   ;;  %s3000_s1 = inlined_call_operand.hbm [shape: f32[8,128], index: 1, kind: input, shape index: {}]   ;;  %s3001_s2 = inlined_call_operand.hbm [shape: f32[8,128], index: 2, kind: input, shape index: {}]   ;;  %s3002_s3 = inlined_call_operand.hbm [shape: bf16[128,512], index: 3, kind: input, shape index: {}]   ;;  %s3003_s4 = inlined_call_operand.hbm [shape: bf16[128,512], index: 4, kind: input, shape index: {}]   ;;  %s3004_s5 = inlined_call_operand.vmem [shape: f32[1,512], index: 5, kind: input, shape index: {}]   ;;  %s3005_s6 = inlined_call_operand.hbm [shape: f32[8,8,128], index: 6, kind: output, shape index: {0}]   ;;  %s3006_s7 = inlined_call_operand.hbm [shape: f32[8,128], index: 7, kind: output, shape index: {1}]   ;;  %s3007_s8 = inlined_call_operand.hbm [shape: f32[8,128], index: 8, kind: output, shape index: {2}]  }
   0x1   :  { %15 = vsyncpa [#allocation9], 0 }
   0x2   :  { %16 = vsyncpa [#allocation12], 0 }
   0x3   :  { %17 = vsyncpa [#allocation7], 0 }
   0x4   :  { %18 = vsyncpa [#allocation16], 0  ;;  %s2291_s27 = smov [#allocation8]   ;;  %s2292_s29 = smov [#allocation11]  }
   0x5   :  { %s37_s28 = sshll.u32 %s2291_s27, 4  ;;  %s56_s30 = sshll.u32 %s2292_s29, 4  ;;  %s38_s28 = int_to_ptr.vmem [resolvable:$true] %s37_s28  ;;  %s2349_s30 = int_to_ptr.vmem [resolvable:$true] %s56_s30 }
   0x6   :  { %s2105_s11 = scalar_lea.hbm %s3000_s1, 128 }
   0x7   :  { %p2106_p0 = scmp.ne.s32.totalorder %s3000_s1, %s2105_s11  ;;  %p2109_p1 = scmp.lt.u32.totalorder %s2105_s11, %s3000_s1 }
   0x9   :  { %p2111_p2 = pnand %p2109_p1, %p2106_p0 }
   0xb   :  { %2114 = shalt.err (!%p2111_p2)
}
   0xc   :  { %s2115_s16 = scalar_lea.vmem %s38_s28, 128  ;;  %p2120_p4 = scmp.lt.s32.totalorder %s38_s28, %s38_s28 }
   0xd   :  { %p2116_p3 = scmp.ne.s32.totalorder %s38_s28, %s2115_s16  ;;  %p2121_p5 = scmp.lt.s32.totalorder %s2115_s16, %s2115_s16 }
   0xf   :  { %p2122_p6 = por %p2121_p5, %p2120_p4 }
  0x11   :  { %p2123_p7 = pnand %p2122_p6, %p2116_p3 }
  0x13   :  { %2126 = shalt.err (!%p2123_p7)
}
  0x14   :  { %40 = dma.hbm_to_vmem [thread:$0]  %s3000_s1, 128, %s38_s28, [#allocation9]  }
  0x15   :  { %s2127_s21 = scalar_lea.hbm %s3002_s3, 4096 }
  0x16   :  { %p2128_p8 = scmp.ne.s32.totalorder %s3002_s3, %s2127_s21  ;;  %p2131_p9 = scmp.lt.u32.totalorder %s2127_s21, %s3002_s3 }
  0x18   :  { %p2133_p10 = pnand %p2131_p9, %p2128_p8 }
  0x1a   :  { %2136 = shalt.err (!%p2133_p10)
}
  0x1b   :  { %s2137_s26 = scalar_lea.vmem %s2349_s30, 4096  ;;  %p2142_p12 = scmp.lt.s32.totalorder %s2349_s30, %s2349_s30 }
  0x1c   :  { %p2138_p11 = scmp.ne.s32.totalorder %s2349_s30, %s2137_s26  ;;  %p2143_p13 = scmp.lt.s32.totalorder %s2137_s26, %s2137_s26 }
  0x1e   :  { %p2144_p0 = por %p2143_p13, %p2142_p12 }
  0x20   :  { %p2145_p1 = pnand %p2144_p0, %p2138_p11 }
  0x22   :  { %2148 = shalt.err (!%p2145_p1)
}
  0x23   :  { %s2293_s1 = smov 256   ;;  %s2294_s27 = smov 16  }
  0x24   :  { %62 = dma.hbm_to_vmem [thread:$0]  %s3002_s3, 4096, %s2349_s30, [#allocation12], %s2293_s1, %s2293_s1, %s2294_s27  }
  0x25   :  { %s2295_s9 = smov [#allocation5]   ;;  %s2149_s13 = scalar_lea.hbm %s2999_s0, 1024 }
  0x26   :  { %s24_s10 = sshll.u32 %s2295_s9, 4  ;;  %p2150_p2 = scmp.ne.s32.totalorder %s2999_s0, %s2149_s13  ;;  %s25_s10 = int_to_ptr.vmem [resolvable:$true] %s24_s10 }
  0x27   :  { %p2153_p3 = scmp.lt.u32.totalorder %s2149_s13, %s2999_s0 }
  0x29   :  { %p2155_p4 = pnand %p2153_p3, %p2150_p2 }
  0x2b   :  { %2158 = shalt.err (!%p2155_p4)
}
  0x2c   :  { %s2159_s18 = scalar_lea.vmem %s25_s10, 1024  ;;  %p2164_p6 = scmp.lt.s32.totalorder %s25_s10, %s25_s10 }
  0x2d   :  { %p2160_p5 = scmp.ne.s32.totalorder %s25_s10, %s2159_s18  ;;  %p2165_p7 = scmp.lt.s32.totalorder %s2159_s18, %s2159_s18 }
  0x2f   :  { %p2166_p8 = por %p2165_p7, %p2164_p6 }
  0x31   :  { %p2167_p9 = pnand %p2166_p8, %p2160_p5 }
  0x33   :  { %2170 = shalt.err (!%p2167_p9)
}
  0x34   :  { %s2296_s3 = smov 128   ;;  %s2297_s30 = smov 8  }
  0x35   :  { %30 = dma.hbm_to_vmem [thread:$0]  %s2999_s0, 1024, %s25_s10, [#allocation6], %s2296_s3, %s2296_s3, %s2297_s30  }
  0x36   :  { %s2298_s21 = smov [#allocation10]   ;;  %s2299_s23 = smov [#allocation13]  }
  0x37   :  { %s47_s22 = sshll.u32 %s2298_s21, 4  ;;  %s68_s24 = sshll.u32 %s2299_s23, 4  ;;  %s48_s22 = int_to_ptr.vmem [resolvable:$true] %s47_s22  ;;  %s69_s24 = int_to_ptr.vmem [resolvable:$true] %s68_s24 }
  0x38   :  { %s2171_s28 = scalar_lea.hbm %s3001_s2, 128 }
  0x39   :  { %p2172_p10 = scmp.ne.s32.totalorder %s3001_s2, %s2171_s28  ;;  %p2175_p11 = scmp.lt.u32.totalorder %s2171_s28, %s3001_s2 }
  0x3b   :  { %p2177_p12 = pnand %p2175_p11, %p2172_p10 }
  0x3d   :  { %2180 = shalt.err (!%p2177_p12)
}
  0x3e   :  { %s2181_s0 = scalar_lea.vmem %s48_s22, 128  ;;  %p2186_p0 = scmp.lt.s32.totalorder %s48_s22, %s48_s22 }
  0x3f   :  { %p2182_p13 = scmp.ne.s32.totalorder %s48_s22, %s2181_s0  ;;  %p2187_p1 = scmp.lt.s32.totalorder %s2181_s0, %s2181_s0 }
  0x41   :  { %p2188_p2 = por %p2187_p1, %p2186_p0 }
  0x43   :  { %p2189_p3 = pnand %p2188_p2, %p2182_p13 }
  0x45   :  { %2192 = shalt.err (!%p2189_p3)
}
  0x46   :  { %50 = dma.hbm_to_vmem [thread:$0]  %s3001_s2, 128, %s48_s22, [#allocation9]  }
  0x47   :  { %s2193_s16 = scalar_lea.hbm %s3003_s4, 4096 }
  0x48   :  { %p2194_p4 = scmp.ne.s32.totalorder %s3003_s4, %s2193_s16  ;;  %p2197_p5 = scmp.lt.u32.totalorder %s2193_s16, %s3003_s4 }
  0x4a   :  { %p2199_p6 = pnand %p2197_p5, %p2194_p4 }
  0x4c   :  { %2202 = shalt.err (!%p2199_p6)
}
  0x4d   :  { %s2203_s21 = scalar_lea.vmem %s69_s24, 4096  ;;  %p2208_p8 = scmp.lt.s32.totalorder %s69_s24, %s69_s24 }
  0x4e   :  { %p2204_p7 = scmp.ne.s32.totalorder %s69_s24, %s2203_s21  ;;  %p2209_p9 = scmp.lt.s32.totalorder %s2203_s21, %s2203_s21 }
  0x50   :  { %p2210_p10 = por %p2209_p9, %p2208_p8 }
  0x52   :  { %p2211_p11 = pnand %p2210_p10, %p2204_p7 }
  0x54   :  { %2214 = shalt.err (!%p2211_p11)
}
  0x55   :  { %74 = dma.hbm_to_vmem [thread:$0]  %s3003_s4, 4096, %s69_s24, [#allocation12], %s2293_s1, %s2293_s1, %s2294_s27  }
  0x56   :  { %2281 = dma.done.wait [#allocation6], 1024  }
  0x57   :  { %2282 = vsyncadd [#allocation6], 4294966272 }
  0x58   :  { %2283 = dma.done.wait [#allocation9], 256  }
  0x59   :  { %2284 = vsyncadd [#allocation9], 4294967040 }
  0x5a   :  { %2285 = dma.done.wait [#allocation12], 8192  }
  0x5b   :  { %2286 = vsyncadd [#allocation12], 4294959104  ;;  %v3008_v0 = vmov 0   ;;  %v1849_v1 = vld [vmem:[#allocation11 + $0x4] ss:$16 sps:$4 sm:$0xff]   ;;  %v102_v34 = vld [vmem:[#allocation5 + $0x8] sm:$0xff] }
  0x5c   :  { %359 = vmatprep.mubr.bf16.mxu0 %v3008_v0  ;;  %432 = vmatprep.mubr.bf16.mxu1 %v3008_v0  ;;  %v1851_v2 = vld [vmem:[#allocation11 + $0xc] ss:$16 sps:$4 sm:$0xff]   ;;  %v1853_v3 = vld [vmem:[#allocation11] ss:$16 sps:$4 sm:$0xff]   ;;  %v1854_v4 = vld [vmem:[#allocation11 + $0x8] ss:$16 sps:$4 sm:$0xff]  }
  0x5d   :  { %327 = vmatprep.subr.bf16.mxu0 %v1849_v1  ;;  %400 = vmatprep.subr.bf16.mxu1 %v1851_v2  ;;  %v1855_v5 = vld [vmem:[#allocation11 + $0x24] ss:$16 sps:$4 sm:$0xff]   ;;  %v1857_v6 = vld [vmem:[#allocation11 + $0x2c] ss:$16 sps:$4 sm:$0xff]   ;;  %v1859_v7 = vld [vmem:[#allocation11 + $0x20] ss:$16 sps:$4 sm:$0xff]  }
  0x5e   :  { %328 = vmatpush1.bf16.msra.mxu0 %v1853_v3  ;;  %401 = vmatpush1.bf16.msra.mxu1 %v1854_v4  ;;  %v1860_v8 = vld [vmem:[#allocation11 + $0x28] ss:$16 sps:$4 sm:$0xff]   ;;  %v1861_v9 = vld [vmem:[#allocation11 + $0x44] ss:$16 sps:$4 sm:$0xff]   ;;  %v1863_v10 = vld [vmem:[#allocation11 + $0x4c] ss:$16 sps:$4 sm:$0xff]  }
  0x5f   :  { %329 = vmatprep.subr.bf16.mxu0 %v1855_v5  ;;  %402 = vmatprep.subr.bf16.mxu1 %v1857_v6  ;;  %v1865_v11 = vld [vmem:[#allocation11 + $0x40] ss:$16 sps:$4 sm:$0xff]   ;;  %v1866_v12 = vld [vmem:[#allocation11 + $0x48] ss:$16 sps:$4 sm:$0xff]   ;;  %v1867_v13 = vld [vmem:[#allocation11 + $0x64] ss:$16 sps:$4 sm:$0xff]  }
  0x60   :  { %v1869_v14 = vld [vmem:[#allocation11 + $0x6c] ss:$16 sps:$4 sm:$0xff]   ;;  %v1871_v15 = vld [vmem:[#allocation11 + $0x60] ss:$16 sps:$4 sm:$0xff]   ;;  %v1872_v16 = vld [vmem:[#allocation11 + $0x68] ss:$16 sps:$4 sm:$0xff]  }
  0x61   :  { %v1873_v17 = vld [vmem:[#allocation11 + $0x84] ss:$16 sps:$4 sm:$0xff]   ;;  %v1875_v18 = vld [vmem:[#allocation11 + $0x8c] ss:$16 sps:$4 sm:$0xff]   ;;  %v1877_v19 = vld [vmem:[#allocation11 + $0x80] ss:$16 sps:$4 sm:$0xff]  }
  0x62   :  { %330 = vmatpush1.bf16.msra.mxu0 %v1859_v7  ;;  %403 = vmatpush1.bf16.msra.mxu1 %v1860_v8  ;;  %v1878_v20 = vld [vmem:[#allocation11 + $0x88] ss:$16 sps:$4 sm:$0xff]   ;;  %v1879_v21 = vld [vmem:[#allocation11 + $0xa4] ss:$16 sps:$4 sm:$0xff]   ;;  %v1881_v22 = vld [vmem:[#allocation11 + $0xac] ss:$16 sps:$4 sm:$0xff]  }
  0x63   :  { %331 = vmatprep.subr.bf16.mxu0 %v1861_v9  ;;  %404 = vmatprep.subr.bf16.mxu1 %v1863_v10  ;;  %v1883_v23 = vld [vmem:[#allocation11 + $0xa0] ss:$16 sps:$4 sm:$0xff]   ;;  %v1884_v24 = vld [vmem:[#allocation11 + $0xa8] ss:$16 sps:$4 sm:$0xff]   ;;  %v1885_v25 = vld [vmem:[#allocation11 + $0xc4] ss:$16 sps:$4 sm:$0xff]  }
  0x64   :  { %v1887_v26 = vld [vmem:[#allocation11 + $0xcc] ss:$16 sps:$4 sm:$0xff]   ;;  %v1889_v27 = vld [vmem:[#allocation11 + $0xc0] ss:$16 sps:$4 sm:$0xff]   ;;  %v1890_v28 = vld [vmem:[#allocation11 + $0xc8] ss:$16 sps:$4 sm:$0xff]  }
  0x65   :  { %v1891_v29 = vld [vmem:[#allocation11 + $0xe4] ss:$16 sps:$4 sm:$0xff]   ;;  %v1893_v30 = vld [vmem:[#allocation11 + $0xec] ss:$16 sps:$4 sm:$0xff]   ;;  %v1895_v31 = vld [vmem:[#allocation11 + $0xe0] ss:$16 sps:$4 sm:$0xff]  }
  0x66   :  { %332 = vmatpush1.bf16.msra.mxu0 %v1865_v11  ;;  %405 = vmatpush1.bf16.msra.mxu1 %v1866_v12  ;;  %v1896_v32 = vld [vmem:[#allocation11 + $0xe8] ss:$16 sps:$4 sm:$0xff]   ;;  %v101_v33 = vld [vmem:[#allocation5] sm:$0xff]  ;;  %v2429_v36 = vld [vmem:[#allocation13 + $0xc] ss:$16 sps:$4 sm:$0xff]   ;;  %s2302_s23 = smov [#allocation14]  }
  0x67   :  { %333 = vmatprep.subr.bf16.mxu0 %v1867_v13  ;;  %406 = vmatprep.subr.bf16.mxu1 %v1869_v14  ;;  %v2427_v35 = vld [vmem:[#allocation13 + $0x4] ss:$16 sps:$4 sm:$0xff]   ;;  %v109_v37 = vpack.c.bf16 %v102_v34, %v101_v33  ;;  %v2431_v38 = vld [vmem:[#allocation13] ss:$16 sps:$4 sm:$0xff]   ;;  %v2433_v39 = vld [vmem:[#allocation13 + $0x8] ss:$16 sps:$4 sm:$0xff]  }
  0x68   :  { %v2437_v40 = vld [vmem:[#allocation13 + $0x24] ss:$16 sps:$4 sm:$0xff]   ;;  %v2439_v41 = vld [vmem:[#allocation13 + $0x2c] ss:$16 sps:$4 sm:$0xff]   ;;  %v2441_v42 = vld [vmem:[#allocation13 + $0x20] ss:$16 sps:$4 sm:$0xff]  }
  0x69   :  { %v2443_v43 = vld [vmem:[#allocation13 + $0x28] ss:$16 sps:$4 sm:$0xff]   ;;  %v103_v44 = vld [vmem:[#allocation5 + $0x10] sm:$0xff]  ;;  %v2451_v47 = vld [vmem:[#allocation13 + $0x4c] ss:$16 sps:$4 sm:$0xff]   ;;  %s1700_s24 = sshll.u32 %s2302_s23, 4  ;;  %s2946_s24 = int_to_ptr.vmem [resolvable:$true] %s1700_s24 }
  0x6a   :  { %334 = vmatpush1.bf16.msra.mxu0 %v1871_v15  ;;  %407 = vmatpush1.bf16.msra.mxu1 %v1872_v16  ;;  %v104_v45 = vld [vmem:[#allocation5 + $0x18] sm:$0xff]  ;;  %v2447_v46 = vld [vmem:[#allocation13 + $0x44] ss:$16 sps:$4 sm:$0xff]   ;;  %v2455_v49 = vld [vmem:[#allocation13 + $0x40] ss:$16 sps:$4 sm:$0xff]   ;;  %v147_v16 = vlaneseq  ;;  %s2303_s25 = smov [#allocation17]  }
  0x6b   :  { %335 = vmatprep.subr.bf16.mxu0 %v1873_v17  ;;  %408 = vmatprep.subr.bf16.mxu1 %v1875_v18  ;;  %v110_v48 = vpack.c.bf16 %v104_v45, %v103_v44  ;;  %v2457_v50 = vld [vmem:[#allocation13 + $0x48] ss:$16 sps:$4 sm:$0xff]   ;;  %v2461_v51 = vld [vmem:[#allocation13 + $0x64] ss:$16 sps:$4 sm:$0xff]   ;;  %v2465_v52 = vld [vmem:[#allocation13 + $0x6c] ss:$16 sps:$4 sm:$0xff]  }
  0x6c   :  { %v2467_v53 = vld [vmem:[#allocation13 + $0x60] ss:$16 sps:$4 sm:$0xff]   ;;  %v2469_v54 = vld [vmem:[#allocation13 + $0x68] ss:$16 sps:$4 sm:$0xff]   ;;  %v2475_v57 = vld [vmem:[#allocation13 + $0x84] ss:$16 sps:$4 sm:$0xff]  }
  0x6d   :  { %v105_v55 = vld [vmem:[#allocation5 + $0x20] sm:$0xff]  ;;  %v106_v56 = vld [vmem:[#allocation5 + $0x28] sm:$0xff]  ;;  %v107_v3 = vld [vmem:[#allocation5 + $0x30] sm:$0xff]  ;;  %v148_v17 = vshrl.u32 %v147_v16, 7  ;;  %s1723_s26 = sshll.u32 %s2303_s25, 4  ;;  %s2948_s26 = int_to_ptr.vmem [resolvable:$true] %s1723_s26 }
  0x6e   :  { %336 = vmatpush1.bf16.msra.mxu0 %v1877_v19  ;;  %409 = vmatpush1.bf16.msra.mxu1 %v1878_v20  ;;  %v2477_v58 = vld [vmem:[#allocation13 + $0x8c] ss:$16 sps:$4 sm:$0xff]   ;;  %v111_v59 = vpack.c.bf16 %v106_v56, %v105_v55  ;;  %v2483_v60 = vld [vmem:[#allocation13 + $0x80] ss:$16 sps:$4 sm:$0xff]   ;;  %v2485_v61 = vld [vmem:[#allocation13 + $0x88] ss:$16 sps:$4 sm:$0xff]  }
  0x6f   :  { %337 = vmatprep.subr.bf16.mxu0 %v1879_v21  ;;  %410 = vmatprep.subr.bf16.mxu1 %v1881_v22  ;;  %v2489_v62 = vld [vmem:[#allocation13 + $0xa4] ss:$16 sps:$4 sm:$0xff]   ;;  %v2491_v63 = vld [vmem:[#allocation13 + $0xac] ss:$16 sps:$4 sm:$0xff]   ;;  %v2493_v1 = vld [vmem:[#allocation13 + $0xa0] ss:$16 sps:$4 sm:$0xff]  }
  0x70   :  { %v2497_v2 = vld [vmem:[#allocation13 + $0xa8] ss:$16 sps:$4 sm:$0xff]   ;;  %v2501_v5 = vld [vmem:[#allocation13 + $0xc4] ss:$16 sps:$4 sm:$0xff]   ;;  %v2503_v6 = vld [vmem:[#allocation13 + $0xcc] ss:$16 sps:$4 sm:$0xff]  }
  0x71   :  { %v108_v4 = vld [vmem:[#allocation5 + $0x38] sm:$0xff]  ;;  %v2509_v8 = vld [vmem:[#allocation13 + $0xc0] ss:$16 sps:$4 sm:$0xff]   ;;  %v2515_v10 = vld [vmem:[#allocation13 + $0xe4] ss:$16 sps:$4 sm:$0xff]   ;;  %v157_v18 = vsub.s32 2, %v148_v17 }
  0x72   :  { %338 = vmatpush1.bf16.msra.mxu0 %v1883_v23  ;;  %411 = vmatpush1.bf16.msra.mxu1 %v1884_v24  ;;  %v112_v7 = vpack.c.bf16 %v108_v4, %v107_v3  ;;  %v2511_v9 = vld [vmem:[#allocation13 + $0xc8] ss:$16 sps:$4 sm:$0xff]   ;;  %v2517_v11 = vld [vmem:[#allocation13 + $0xec] ss:$16 sps:$4 sm:$0xff]   ;;  %v2521_v12 = vld [vmem:[#allocation13 + $0xe0] ss:$16 sps:$4 sm:$0xff]  }
  0x73   :  { %339 = vmatprep.subr.bf16.mxu0 %v1885_v25  ;;  %412 = vmatprep.subr.bf16.mxu1 %v1887_v26  ;;  %v2523_v13 = vld [vmem:[#allocation13 + $0xe8] ss:$16 sps:$4 sm:$0xff]   ;;  %v97_v14 = vld [vmem:[#allocation8] sm:$0xff]  ;;  %v161_v19 = vsub.s32 3, %v148_v17  ;;  %v149_v20 = vsub.s32 0, %v148_v17  ;;  %v153_v22 = vsub.s32 1, %v148_v17 }
  0x74   :  { %v546_v15 = vpack.c.bf16 %v97_v14, %v97_v14  ;;  %v145_v21 = vld [vmem:[%s3004_s5] sm:$0xf]  ;;  %s2301_s5 = smov [#allocation15]  }
  0x75   :  { %v2570_v23 = vrot.slane %v145_v21, %v157_v18  ;;  %v2576_v26 = vrot.slane %v145_v21, %v161_v19  ;;  %s1713_s27 = sshll.u32 %s2301_s5, 4  ;;  %s1714_s27 = int_to_ptr.vmem [resolvable:$true] %s1713_s27 }
  0x76   :  { %340 = vmatpush1.bf16.msra.mxu0 %v1889_v27  ;;  %413 = vmatpush1.bf16.msra.mxu1 %v1890_v28  ;;  %v150_v27 = vrot.slane %v145_v21, %v149_v20  ;;  %s2215_s28 = scalar_lea.vmem %s1714_s27, 128  ;;  %p2220_p13 = scmp.lt.s32.totalorder %s1714_s27, %s1714_s27 }
  0x77   :  { %341 = vmatprep.subr.bf16.mxu0 %v1891_v29  ;;  %414 = vmatprep.subr.bf16.mxu1 %v1893_v30  ;;  %v154_v30 = vrot.slane %v145_v21, %v153_v22  ;;  %p2216_p12 = scmp.ne.s32.totalorder %s1714_s27, %s2215_s28  ;;  %p2221_p0 = scmp.lt.s32.totalorder %s2215_s28, %s2215_s28 }
  0x79   :  { %p2222_p1 = por %p2221_p0, %p2220_p13 }
  0x7a   :  { %342 = vmatpush1.bf16.msra.mxu0 %v1895_v31  ;;  %415 = vmatpush1.bf16.msra.mxu1 %v1896_v32 }
  0x7b   :  { %707 = vmatprep.subr.bf16.mxu0 %v2427_v35  ;;  %748 = vmatprep.subr.bf16.mxu1 %v2429_v36  ;;  %p2223_p2 = pnand %p2222_p1, %p2216_p12 }
  0x7d   :  { %360 = vmatmul.mubr.bf16.vlgmr.msra.gmra.mrb[0].mxu0 %v109_v37  ;;  %433 = vmatmul.mubr.bf16.vlgmr.msra.gmra.mrb[0].mxu1 %v109_v37 }
  0x7e   :  { %708 = vmatpush1.bf16.msra.mxu0 %v2431_v38  ;;  %749 = vmatpush1.bf16.msra.mxu1 %v2433_v39 }
  0x7f   :  { %709 = vmatprep.subr.bf16.mxu0 %v2437_v40  ;;  %750 = vmatprep.subr.bf16.mxu1 %v2439_v41 }
  0x80   :  { %369 = vmatprep.mubr.bf16.mxu0 %v3008_v0  ;;  %442 = vmatprep.mubr.bf16.mxu1 %v3008_v0 }
  0x82   :  { %710 = vmatpush1.bf16.msra.mxu0 %v2441_v42  ;;  %751 = vmatpush1.bf16.msra.mxu1 %v2443_v43 }
  0x83   :  { %711 = vmatprep.subr.bf16.mxu0 %v2447_v46  ;;  %752 = vmatprep.subr.bf16.mxu1 %v2451_v47 }
  0x85   :  { %370 = vmatmul.mubr.bf16.gmra.mrb[4].mxu0 %v110_v48  ;;  %443 = vmatmul.mubr.bf16.gmra.mrb[4].mxu1 %v110_v48 }
  0x86   :  { %712 = vmatpush1.bf16.msra.mxu0 %v2455_v49  ;;  %753 = vmatpush1.bf16.msra.mxu1 %v2457_v50 }
  0x87   :  { %713 = vmatprep.subr.bf16.mxu0 %v2461_v51  ;;  %754 = vmatprep.subr.bf16.mxu1 %v2465_v52 }
  0x88   :  { %379 = vmatprep.mubr.bf16.mxu0 %v3008_v0  ;;  %452 = vmatprep.mubr.bf16.mxu1 %v3008_v0 }
  0x8a   :  { %714 = vmatpush1.bf16.msra.mxu0 %v2467_v53  ;;  %755 = vmatpush1.bf16.msra.mxu1 %v2469_v54 }
  0x8b   :  { %715 = vmatprep.subr.bf16.mxu0 %v2475_v57  ;;  %756 = vmatprep.subr.bf16.mxu1 %v2477_v58 }
  0x8d   :  { %380 = vmatmul.mubr.bf16.gmra.mrb[8].mxu0 %v111_v59  ;;  %453 = vmatmul.mubr.bf16.gmra.mrb[8].mxu1 %v111_v59 }
  0x8e   :  { %716 = vmatpush1.bf16.msra.mxu0 %v2483_v60  ;;  %757 = vmatpush1.bf16.msra.mxu1 %v2485_v61 }
  0x8f   :  { %717 = vmatprep.subr.bf16.mxu0 %v2489_v62  ;;  %758 = vmatprep.subr.bf16.mxu1 %v2491_v63 }
  0x90   :  { %389 = vmatprep.mubr.bf16.mxu0 %v3008_v0  ;;  %462 = vmatprep.mubr.bf16.mxu1 %v3008_v0 }
  0x92   :  { %718 = vmatpush1.bf16.msra.mxu0 %v2493_v1  ;;  %759 = vmatpush1.bf16.msra.mxu1 %v2497_v2 }
  0x93   :  { %719 = vmatprep.subr.bf16.mxu0 %v2501_v5  ;;  %760 = vmatprep.subr.bf16.mxu1 %v2503_v6 }
  0x95   :  { %390 = vmatmul.mubr.bf16.gmra.mrb[12].mxu0 %v112_v7  ;;  %463 = vmatmul.mubr.bf16.gmra.mrb[12].mxu1 %v112_v7 }
  0x96   :  { %720 = vmatpush1.bf16.msra.mxu0 %v2509_v8  ;;  %761 = vmatpush1.bf16.msra.mxu1 %v2511_v9 }
  0x97   :  { %721 = vmatprep.subr.bf16.mxu0 %v2515_v10  ;;  %762 = vmatprep.subr.bf16.mxu1 %v2517_v11 }
  0x98   :  { %739 = vmatprep.mubr.bf16.mxu0 %v3008_v0  ;;  %780 = vmatprep.mubr.bf16.mxu1 %v3008_v0 }
  0x9a   :  { %722 = vmatpush1.bf16.msra.mxu0 %v2521_v12  ;;  %763 = vmatpush1.bf16.msra.mxu1 %v2523_v13 }
  0x9b   :  { %830 = vmatprep.subr.bf16.mxu0 %v2427_v35  ;;  %871 = vmatprep.subr.bf16.mxu1 %v2429_v36 }
  0x9d   :  { %740 = vmatmul.mubr.bf16.vlgmr.msra.gmra.mrb[16].mxu0 %v546_v15  ;;  %781 = vmatmul.mubr.bf16.vlgmr.msra.gmra.mrb[16].mxu1 %v546_v15 }
  0x9e   :  { %831 = vmatpush1.bf16.msra.mxu0 %v2431_v38  ;;  %872 = vmatpush1.bf16.msra.mxu1 %v2433_v39 }
  0x9f   :  { %832 = vmatprep.subr.bf16.mxu0 %v2437_v40  ;;  %873 = vmatprep.subr.bf16.mxu1 %v2439_v41 }
  0xa0   :  { %862 = vmatprep.mubr.bf16.mxu0 %v3008_v0  ;;  %903 = vmatprep.mubr.bf16.mxu1 %v3008_v0 }
  0xa2   :  { %833 = vmatpush1.bf16.msra.mxu0 %v2441_v42  ;;  %874 = vmatpush1.bf16.msra.mxu1 %v2443_v43 }
  0xa3   :  { %834 = vmatprep.subr.bf16.mxu0 %v2447_v46  ;;  %875 = vmatprep.subr.bf16.mxu1 %v2451_v47 }
  0xa6   :  { %835 = vmatpush1.bf16.msra.mxu0 %v2455_v49  ;;  %876 = vmatpush1.bf16.msra.mxu1 %v2457_v50 }
  0xa7   :  { %836 = vmatprep.subr.bf16.mxu0 %v2461_v51  ;;  %877 = vmatprep.subr.bf16.mxu1 %v2465_v52 }
  0xaa   :  { %837 = vmatpush1.bf16.msra.mxu0 %v2467_v53  ;;  %878 = vmatpush1.bf16.msra.mxu1 %v2469_v54 }
  0xab   :  { %838 = vmatprep.subr.bf16.mxu0 %v2475_v57  ;;  %879 = vmatprep.subr.bf16.mxu1 %v2477_v58 }
  0xae   :  { %839 = vmatpush1.bf16.msra.mxu0 %v2483_v60  ;;  %880 = vmatpush1.bf16.msra.mxu1 %v2485_v61 }
  0xaf   :  { %840 = vmatprep.subr.bf16.mxu0 %v2489_v62  ;;  %881 = vmatprep.subr.bf16.mxu1 %v2491_v63 }
  0xb2   :  { %841 = vmatpush1.bf16.msra.mxu0 %v2493_v1  ;;  %882 = vmatpush1.bf16.msra.mxu1 %v2497_v2 }
  0xb3   :  { %842 = vmatprep.subr.bf16.mxu0 %v2501_v5  ;;  %883 = vmatprep.subr.bf16.mxu1 %v2503_v6 }
  0xb6   :  { %843 = vmatpush1.bf16.msra.mxu0 %v2509_v8  ;;  %884 = vmatpush1.bf16.msra.mxu1 %v2511_v9 }
  0xb7   :  { %844 = vmatprep.subr.bf16.mxu0 %v2515_v10  ;;  %885 = vmatprep.subr.bf16.mxu1 %v2517_v11 }
  0xba   :  { %845 = vmatpush1.bf16.msra.mxu0 %v2521_v12  ;;  %886 = vmatpush1.bf16.msra.mxu1 %v2523_v13 }
  0xbb   :  { %954 = vmatprep.subr.bf16.mxu0 %v2427_v35  ;;  %995 = vmatprep.subr.bf16.mxu1 %v2429_v36 }
 0x150   :  { %v2572_v24 = vpop.f32.mrb[0].mxu0  ;;  %v2574_v25 = vpop.f32.mrb[0].mxu1 }
 0x151   :  { %v363_v28 = vpop.f32.mrb[1].mxu0  ;;  %v436_v29 = vpop.f32.mrb[1].mxu1 }
 0x152   :  { %v365_v31 = vpop.f32.mrb[2].mxu0  ;;  %v438_v32 = vpop.f32.mrb[2].mxu1 }
 0x153   :  { %v2578_v33 = vadd.f32 %v365_v31, %v150_v27  ;;  %v367_v34 = vpop.f32.mrb[3].mxu0  ;;  %v2581_v37 = vadd.f32 %v438_v32, %v2570_v23  ;;  %v440_v44 = vpop.f32.mrb[3].mxu1 }
 0x154   :  { %v2583_v45 = vadd.f32 %v367_v34, %v154_v30  ;;  %v2586_v48 = vadd.f32 %v440_v44, %v2576_v26 }
 0x158   :  { %v371_v55 = vpop.f32.mrb[4].mxu0  ;;  %v444_v56 = vpop.f32.mrb[4].mxu1 }
 0x159   :  { %v2588_v59 = vadd.f32 %v371_v55, %v150_v27  ;;  %v373_v3 = vpop.f32.mrb[5].mxu0  ;;  %v2591_v4 = vadd.f32 %v444_v56, %v2570_v23  ;;  %v446_v7 = vpop.f32.mrb[5].mxu1 }
 0x15a   :  { %v2593_v14 = vadd.f32 %v373_v3, %v154_v30  ;;  %v375_v15 = vpop.f32.mrb[6].mxu0  ;;  %v2596_v16 = vadd.f32 %v446_v7, %v2576_v26  ;;  %v448_v17 = vpop.f32.mrb[6].mxu1 }
 0x15b   :  { %v2598_v18 = vadd.f32 %v375_v15, %v150_v27  ;;  %v377_v19 = vpop.f32.mrb[7].mxu0  ;;  %v2601_v20 = vadd.f32 %v448_v17, %v2570_v23  ;;  %v450_v21 = vpop.f32.mrb[7].mxu1 }
 0x15c   :  { %3010 = vst [vmem:[#allocation23_spill] sm:$0xff] %v2596_v16  ;;  %v2603_v22 = vadd.f32 %v377_v19, %v154_v30  ;;  %v2606_v31 = vadd.f32 %v450_v21, %v2576_v26 }
 0x15d   :  { %3011 = vst [vmem:[#allocation24_spill] sm:$0xff] %v2598_v18  ;;  %3012 = vst [vmem:[#allocation25_spill] sm:$0xff] %v2601_v20 }
 0x15e   :  { %3013 = vst [vmem:[#allocation26_spill] sm:$0xff] %v2603_v22  ;;  %3014 = vst [vmem:[#allocation27_spill] sm:$0xff] %v2606_v31 }
 0x160   :  { %v381_v32 = vpop.f32.mrb[8].mxu0  ;;  %v454_v34 = vpop.f32.mrb[8].mxu1 }
 0x161   :  { %v2608_v44 = vadd.f32 %v381_v32, %v150_v27  ;;  %v383_v55 = vpop.f32.mrb[9].mxu0  ;;  %v2611_v56 = vadd.f32 %v454_v34, %v2570_v23  ;;  %v456_v3 = vpop.f32.mrb[9].mxu1 }
 0x162   :  { %v2613_v7 = vadd.f32 %v383_v55, %v154_v30  ;;  %v385_v15 = vpop.f32.mrb[10].mxu0  ;;  %v2616_v17 = vadd.f32 %v456_v3, %v2576_v26  ;;  %v458_v19 = vpop.f32.mrb[10].mxu1 }
 0x163   :  { %3015 = vst [vmem:[#allocation28_spill] sm:$0xff] %v2608_v44  ;;  %3016 = vst [vmem:[#allocation29_spill] sm:$0xff] %v2611_v56  ;;  %v2618_v0 = vadd.f32 %v385_v15, %v150_v27  ;;  %v387_v21 = vpop.f32.mrb[11].mxu0  ;;  %v2621_v31 = vadd.f32 %v458_v19, %v2570_v23  ;;  %v460_v32 = vpop.f32.mrb[11].mxu1 }
 0x164   :  { %3017 = vst [vmem:[#allocation30_spill] sm:$0xff] %v2613_v7  ;;  %3018 = vst [vmem:[#allocation31_spill] sm:$0xff] %v2616_v17  ;;  %v2623_v44 = vadd.f32 %v387_v21, %v154_v30  ;;  %v2626_v34 = vadd.f32 %v460_v32, %v2576_v26 }
 0x165   :  { %3019 = vst [vmem:[#allocation32_spill] sm:$0xff] %v2618_v0  ;;  %3020 = vst [vmem:[#allocation33_spill] sm:$0xff] %v2621_v31 }
 0x166   :  { %3021 = vst [vmem:[#allocation34_spill] sm:$0xff] %v2623_v44  ;;  %3022 = vst [vmem:[#allocation35_spill] sm:$0xff] %v2626_v34 }
 0x168   :  { %v391_v56 = vpop.f32.mrb[12].mxu0  ;;  %v464_v55 = vpop.f32.mrb[12].mxu1 }
 0x169   :  { %v2628_v7 = vadd.f32 %v391_v56, %v150_v27  ;;  %v393_v22 = vpop.f32.mrb[13].mxu0  ;;  %v2631_v3 = vadd.f32 %v464_v55, %v2570_v23  ;;  %v466_v15 = vpop.f32.mrb[13].mxu1 }
 0x16a   :  { %v2633_v0 = vadd.f32 %v393_v22, %v154_v30  ;;  %v395_v17 = vpop.f32.mrb[14].mxu0  ;;  %v2636_v19 = vadd.f32 %v466_v15, %v2576_v26  ;;  %v468_v21 = vpop.f32.mrb[14].mxu1  ;;  %v362_v22 = vadd.f32 %v2572_v24, %v150_v27  ;;  %v364_v15 = vadd.f32 %v363_v28, %v154_v30 }
 0x16b   :  { %3023 = vst [vmem:[#allocation36_spill] sm:$0xff] %v2628_v7  ;;  %3024 = vst [vmem:[#allocation37_spill] sm:$0xff] %v2631_v3  ;;  %v2638_v44 = vadd.f32 %v395_v17, %v150_v27  ;;  %v397_v32 = vpop.f32.mrb[15].mxu0  ;;  %v2641_v34 = vadd.f32 %v468_v21, %v2570_v23  ;;  %v470_v56 = vpop.f32.mrb[15].mxu1 }
 0x16c   :  { %3025 = vst [vmem:[#allocation38_spill] sm:$0xff] %v2633_v0  ;;  %3026 = vst [vmem:[#allocation39_spill] sm:$0xff] %v2636_v19  ;;  %v2643_v7 = vadd.f32 %v397_v32, %v154_v30  ;;  %v2646_v55 = vadd.f32 %v470_v56, %v2576_v26  ;;  %v435_v0 = vadd.f32 %v2574_v25, %v2570_v23 }
 0x16d   :  { %3027 = vst [vmem:[#allocation40_spill] sm:$0xff] %v2638_v44  ;;  %3028 = vst [vmem:[#allocation41_spill] sm:$0xff] %v2641_v34  ;;  %v437_v19 = vadd.f32 %v436_v29, %v2576_v26 }
 0x16e   :  { %3029 = vst [vmem:[#allocation42_spill] sm:$0xff] %v2643_v7  ;;  %3030 = vst [vmem:[#allocation43_spill] sm:$0xff] %v2646_v55 }
 0x170   :  { %v741_v17 = vpop.f32.mrb[16].mxu0  ;;  %v782_v44 = vpop.f32.mrb[16].mxu1 }
 0x171   :  { %v789_v3 = vadd.f32 %v741_v17, %v362_v22  ;;  %v791_v31 = vadd.f32 %v782_v44, %v435_v0  ;;  %v743_v21 = vpop.f32.mrb[17].mxu0  ;;  %v784_v34 = vpop.f32.mrb[17].mxu1  ;;  %v99_v0 = vld [vmem:[#allocation10] sm:$0xff]  ;;  %v3031_v22 = vmov 0  }
 0x172   :  { %v790_v20 = vadd.f32 %v743_v21, %v364_v15  ;;  %v792_v32 = vadd.f32 %v784_v34, %v437_v19  ;;  %v745_v7 = vpop.f32.mrb[18].mxu0  ;;  %v786_v18 = vpop.f32.mrb[18].mxu1 }
 0x173   :  { %v1812_v56 = vmul.f32 -1.442695, %v789_v3  ;;  %v746_v55 = vpop.f32.mrb[19].mxu0  ;;  %v787_v16 = vpop.f32.mrb[19].mxu1  ;;  %v1814_v23 = vmul.f32 -1.442695, %v791_v31 }
 0x174   :  { %v1813_v24 = vmul.f32 -1.442695, %v790_v20 }
 0x175   :  { %1945 = vpow2.f32 %v1812_v56 }
 0x176   :  { %1947 = vpow2.f32 %v1813_v24 }
 0x177   :  { %1949 = vpow2.f32 %v1814_v23 }
 0x17f   :  { %v1946_v25 = vpop.eup %1945 }
 0x180   :  { %v796_v27 = vadd.f32 1.0, %v1946_v25  ;;  %v1948_v26 = vpop.eup %1947 }
 0x181   :  { %v803_v28 = vadd.f32 1.0, %v1948_v26  ;;  %v1950_v29 = vpop.eup %1949 }
 0x182   :  { %1951 = vrcp.f32 %v796_v27  ;;  %v812_v34 = vadd.f32 1.0, %v1950_v29 }
 0x183   :  { %1953 = vtanh.f32 %v792_v32 }
 0x184   :  { %1955 = vrcp.f32 %v803_v28 }
 0x185   :  { %1957 = vrcp.f32 %v812_v34 }
 0x18c   :  { %v1952_v30 = vpop.eup %1951 }
 0x18d   :  { %v1954_v44 = vpop.eup %1953  ;;  %v799_v18 = vmul.f32 %v1952_v30, %v99_v0 }
 0x18e   :  { %v1956_v7 = vpop.eup %1955 }
 0x18f   :  { %v807_v16 = vmul.f32 %v1956_v7, %v1954_v44  ;;  %v1958_v31 = vpop.eup %1957 }
 0x191   :  { %v2652_v20 = vadd.f32 %v807_v16, %v799_v18 }
 0x193   :  { %1959 = vtanh.f32 %v2652_v20 }
 0x19d   :  { %v1960_v3 = vpop.eup %1959 }
 0x19e   :  { %v816_v19 = vmul.f32 %v1960_v3, %v1958_v31 }
 0x1a0   :  { %819 = vst [vmem:[#allocation14] sm:$0xff] %v816_v19  ;;  %v829_v55 = vpack.c.bf16 %v816_v19, %v816_v19 }
 0x1a2   :  { %863 = vmatmul.mubr.bf16.vlgmr.msra.gmra.mrb[20].mxu0 %v829_v55  ;;  %904 = vmatmul.mubr.bf16.vlgmr.msra.gmra.mrb[20].mxu1 %v829_v55 }
 0x1a3   :  { %955 = vmatpush1.bf16.msra.mxu0 %v2431_v38  ;;  %996 = vmatpush1.bf16.msra.mxu1 %v2433_v39 }
 0x1a4   :  { %956 = vmatprep.subr.bf16.mxu0 %v2437_v40  ;;  %997 = vmatprep.subr.bf16.mxu1 %v2439_v41 }
 0x1a5   :  { %986 = vmatprep.mubr.bf16.mxu0 %v3031_v22  ;;  %1027 = vmatprep.mubr.bf16.mxu1 %v3031_v22 }
 0x1a7   :  { %957 = vmatpush1.bf16.msra.mxu0 %v2441_v42  ;;  %998 = vmatpush1.bf16.msra.mxu1 %v2443_v43 }
 0x1a8   :  { %958 = vmatprep.subr.bf16.mxu0 %v2447_v46  ;;  %999 = vmatprep.subr.bf16.mxu1 %v2451_v47 }
 0x1ab   :  { %959 = vmatpush1.bf16.msra.mxu0 %v2455_v49  ;;  %1000 = vmatpush1.bf16.msra.mxu1 %v2457_v50 }
 0x1ac   :  { %960 = vmatprep.subr.bf16.mxu0 %v2461_v51  ;;  %1001 = vmatprep.subr.bf16.mxu1 %v2465_v52 }
 0x1af   :  { %961 = vmatpush1.bf16.msra.mxu0 %v2467_v53  ;;  %1002 = vmatpush1.bf16.msra.mxu1 %v2469_v54 }
 0x1b0   :  { %962 = vmatprep.subr.bf16.mxu0 %v2475_v57  ;;  %1003 = vmatprep.subr.bf16.mxu1 %v2477_v58 }
 0x1b3   :  { %963 = vmatpush1.bf16.msra.mxu0 %v2483_v60  ;;  %1004 = vmatpush1.bf16.msra.mxu1 %v2485_v61 }
 0x1b4   :  { %964 = vmatprep.subr.bf16.mxu0 %v2489_v62  ;;  %1005 = vmatprep.subr.bf16.mxu1 %v2491_v63 }
 0x1b7   :  { %965 = vmatpush1.bf16.msra.mxu0 %v2493_v1  ;;  %1006 = vmatpush1.bf16.msra.mxu1 %v2497_v2 }
 0x1b8   :  { %966 = vmatprep.subr.bf16.mxu0 %v2501_v5  ;;  %1007 = vmatprep.subr.bf16.mxu1 %v2503_v6 }
 0x1bb   :  { %967 = vmatpush1.bf16.msra.mxu0 %v2509_v8  ;;  %1008 = vmatpush1.bf16.msra.mxu1 %v2511_v9 }
 0x1bc   :  { %968 = vmatprep.subr.bf16.mxu0 %v2515_v10  ;;  %1009 = vmatprep.subr.bf16.mxu1 %v2517_v11 }
 0x1bf   :  { %969 = vmatpush1.bf16.msra.mxu0 %v2521_v12  ;;  %1010 = vmatpush1.bf16.msra.mxu1 %v2523_v13 }
 0x1c0   :  { %1078 = vmatprep.subr.bf16.mxu0 %v2427_v35  ;;  %1119 = vmatprep.subr.bf16.mxu1 %v2429_v36 }
 0x275   :  { %v864_v15 = vpop.f32.mrb[20].mxu0  ;;  %v905_v17 = vpop.f32.mrb[20].mxu1 }
 0x276   :  { %v912_v21 = vadd.f32 %v864_v15, %v2578_v33  ;;  %v914_v32 = vadd.f32 %v905_v17, %v2581_v37  ;;  %v866_v56 = vpop.f32.mrb[21].mxu0  ;;  %v907_v24 = vpop.f32.mrb[21].mxu1 }
 0x277   :  { %v913_v23 = vadd.f32 %v866_v56, %v2583_v45  ;;  %v915_v25 = vadd.f32 %v907_v24, %v2586_v48  ;;  %v868_v27 = vpop.f32.mrb[22].mxu0  ;;  %v909_v26 = vpop.f32.mrb[22].mxu1 }
 0x278   :  { %v1815_v28 = vmul.f32 -1.442695, %v912_v21  ;;  %v869_v0 = vpop.f32.mrb[23].mxu0  ;;  %v910_v29 = vpop.f32.mrb[23].mxu1  ;;  %v1817_v44 = vmul.f32 -1.442695, %v914_v32 }
 0x279   :  { %v1816_v30 = vmul.f32 -1.442695, %v913_v23 }
 0x27a   :  { %1961 = vpow2.f32 %v1815_v28  ;;  %v3032_v28 = vld [vmem:[#allocation23_spill] sm:$0xff] }
 0x27b   :  { %1963 = vpow2.f32 %v1816_v30 }
 0x27c   :  { %1965 = vpow2.f32 %v1817_v44 }
 0x284   :  { %v1962_v18 = vpop.eup %1961 }
 0x285   :  { %v919_v7 = vadd.f32 1.0, %v1962_v18  ;;  %v1964_v33 = vpop.eup %1963 }
 0x286   :  { %v926_v37 = vadd.f32 1.0, %v1964_v33  ;;  %v1966_v45 = vpop.eup %1965 }
 0x287   :  { %1967 = vrcp.f32 %v919_v7  ;;  %v935_v3 = vadd.f32 1.0, %v1966_v45 }
 0x288   :  { %1969 = vtanh.f32 %v915_v25 }
 0x289   :  { %1971 = vrcp.f32 %v926_v37 }
 0x28a   :  { %1973 = vrcp.f32 %v935_v3 }
 0x291   :  { %v1968_v34 = vpop.eup %1967 }
 0x292   :  { %v1970_v48 = vpop.eup %1969  ;;  %v922_v16 = vmul.f32 %v1968_v34, %v2652_v20 }
 0x293   :  { %v1972_v31 = vpop.eup %1971 }
 0x294   :  { %v930_v19 = vmul.f32 %v1972_v31, %v1970_v48  ;;  %v1974_v15 = vpop.eup %1973 }
 0x296   :  { %v2694_v55 = vadd.f32 %v930_v19, %v922_v16 }
 0x298   :  { %1975 = vtanh.f32 %v2694_v55 }
 0x2a2   :  { %v1976_v17 = vpop.eup %1975 }
 0x2a3   :  { %v939_v21 = vmul.f32 %v1976_v17, %v1974_v15 }
 0x2a5   :  { %943 = vst [vmem:[#allocation14 + $0x8] sm:$0xff] %v939_v21  ;;  %v953_v32 = vpack.c.bf16 %v939_v21, %v939_v21 }
 0x2a7   :  { %987 = vmatmul.mubr.bf16.vlgmr.msra.gmra.mrb[24].mxu0 %v953_v32  ;;  %1028 = vmatmul.mubr.bf16.vlgmr.msra.gmra.mrb[24].mxu1 %v953_v32 }
 0x2a8   :  { %1079 = vmatpush1.bf16.msra.mxu0 %v2431_v38  ;;  %1120 = vmatpush1.bf16.msra.mxu1 %v2433_v39 }
 0x2a9   :  { %1080 = vmatprep.subr.bf16.mxu0 %v2437_v40  ;;  %1121 = vmatprep.subr.bf16.mxu1 %v2439_v41 }
 0x2aa   :  { %1110 = vmatprep.mubr.bf16.mxu0 %v3031_v22  ;;  %1151 = vmatprep.mubr.bf16.mxu1 %v3031_v22 }
 0x2ac   :  { %1081 = vmatpush1.bf16.msra.mxu0 %v2441_v42  ;;  %1122 = vmatpush1.bf16.msra.mxu1 %v2443_v43 }
 0x2ad   :  { %1082 = vmatprep.subr.bf16.mxu0 %v2447_v46  ;;  %1123 = vmatprep.subr.bf16.mxu1 %v2451_v47 }
 0x2b0   :  { %1083 = vmatpush1.bf16.msra.mxu0 %v2455_v49  ;;  %1124 = vmatpush1.bf16.msra.mxu1 %v2457_v50 }
 0x2b1   :  { %1084 = vmatprep.subr.bf16.mxu0 %v2461_v51  ;;  %1125 = vmatprep.subr.bf16.mxu1 %v2465_v52 }
 0x2b4   :  { %1085 = vmatpush1.bf16.msra.mxu0 %v2467_v53  ;;  %1126 = vmatpush1.bf16.msra.mxu1 %v2469_v54 }
 0x2b5   :  { %1086 = vmatprep.subr.bf16.mxu0 %v2475_v57  ;;  %1127 = vmatprep.subr.bf16.mxu1 %v2477_v58 }
 0x2b8   :  { %1087 = vmatpush1.bf16.msra.mxu0 %v2483_v60  ;;  %1128 = vmatpush1.bf16.msra.mxu1 %v2485_v61 }
 0x2b9   :  { %1088 = vmatprep.subr.bf16.mxu0 %v2489_v62  ;;  %1129 = vmatprep.subr.bf16.mxu1 %v2491_v63 }
 0x2bc   :  { %1089 = vmatpush1.bf16.msra.mxu0 %v2493_v1  ;;  %1130 = vmatpush1.bf16.msra.mxu1 %v2497_v2 }
 0x2bd   :  { %1090 = vmatprep.subr.bf16.mxu0 %v2501_v5  ;;  %1131 = vmatprep.subr.bf16.mxu1 %v2503_v6 }
 0x2c0   :  { %1091 = vmatpush1.bf16.msra.mxu0 %v2509_v8  ;;  %1132 = vmatpush1.bf16.msra.mxu1 %v2511_v9 }
 0x2c1   :  { %1092 = vmatprep.subr.bf16.mxu0 %v2515_v10  ;;  %1133 = vmatprep.subr.bf16.mxu1 %v2517_v11 }
 0x2c4   :  { %1093 = vmatpush1.bf16.msra.mxu0 %v2521_v12  ;;  %1134 = vmatpush1.bf16.msra.mxu1 %v2523_v13 }
 0x2c5   :  { %1202 = vmatprep.subr.bf16.mxu0 %v2427_v35  ;;  %1243 = vmatprep.subr.bf16.mxu1 %v2429_v36 }
 0x37a   :  { %v988_v20 = vpop.f32.mrb[24].mxu0  ;;  %v1029_v56 = vpop.f32.mrb[24].mxu1 }
 0x37b   :  { %v1036_v24 = vadd.f32 %v988_v20, %v2588_v59  ;;  %v1038_v23 = vadd.f32 %v1029_v56, %v2591_v4  ;;  %v990_v25 = vpop.f32.mrb[25].mxu0  ;;  %v1031_v27 = vpop.f32.mrb[25].mxu1 }
 0x37c   :  { %v1037_v26 = vadd.f32 %v990_v25, %v2593_v14  ;;  %v1039_v0 = vadd.f32 %v1031_v27, %v3032_v28  ;;  %v992_v29 = vpop.f32.mrb[26].mxu0  ;;  %v1033_v30 = vpop.f32.mrb[26].mxu1  ;;  %v3034_v27 = vld [vmem:[#allocation25_spill] sm:$0xff] }
 0x37d   :  { %v1818_v44 = vmul.f32 -1.442695, %v1036_v24  ;;  %v993_v18 = vpop.f32.mrb[27].mxu0  ;;  %v1034_v7 = vpop.f32.mrb[27].mxu1  ;;  %v1820_v37 = vmul.f32 -1.442695, %v1038_v23 }
 0x37e   :  { %v1819_v33 = vmul.f32 -1.442695, %v1037_v26  ;;  %v3033_v23 = vld [vmem:[#allocation24_spill] sm:$0xff]  ;;  %v3035_v29 = vld [vmem:[#allocation26_spill] sm:$0xff] }
 0x37f   :  { %1977 = vpow2.f32 %v1818_v44  ;;  %v3036_v44 = vld [vmem:[#allocation27_spill] sm:$0xff] }
 0x380   :  { %1979 = vpow2.f32 %v1819_v33 }
 0x381   :  { %1981 = vpow2.f32 %v1820_v37 }
 0x389   :  { %v1978_v45 = vpop.eup %1977 }
 0x38a   :  { %v1043_v34 = vadd.f32 1.0, %v1978_v45  ;;  %v1980_v59 = vpop.eup %1979 }
 0x38b   :  { %v1050_v4 = vadd.f32 1.0, %v1980_v59  ;;  %v1982_v14 = vpop.eup %1981 }
 0x38c   :  { %1983 = vrcp.f32 %v1043_v34  ;;  %v1059_v19 = vadd.f32 1.0, %v1982_v14 }
 0x38d   :  { %1985 = vtanh.f32 %v1039_v0 }
 0x38e   :  { %1987 = vrcp.f32 %v1050_v4 }
 0x38f   :  { %1989 = vrcp.f32 %v1059_v19 }
 0x396   :  { %v1984_v48 = vpop.eup %1983 }
 0x397   :  { %v1986_v16 = vpop.eup %1985  ;;  %v1046_v31 = vmul.f32 %v1984_v48, %v2694_v55 }
 0x398   :  { %v1988_v3 = vpop.eup %1987 }
 0x399   :  { %v1054_v15 = vmul.f32 %v1988_v3, %v1986_v16  ;;  %v1990_v21 = vpop.eup %1989 }
 0x39b   :  { %v2736_v17 = vadd.f32 %v1054_v15, %v1046_v31 }
 0x39d   :  { %1991 = vtanh.f32 %v2736_v17 }
 0x3a7   :  { %v1992_v32 = vpop.eup %1991 }
 0x3a8   :  { %v1063_v20 = vmul.f32 %v1992_v32, %v1990_v21 }
 0x3aa   :  { %1067 = vst [vmem:[#allocation14 + $0x10] sm:$0xff] %v1063_v20  ;;  %v1077_v56 = vpack.c.bf16 %v1063_v20, %v1063_v20 }
 0x3ac   :  { %1111 = vmatmul.mubr.bf16.vlgmr.msra.gmra.mrb[28].mxu0 %v1077_v56  ;;  %1152 = vmatmul.mubr.bf16.vlgmr.msra.gmra.mrb[28].mxu1 %v1077_v56 }
 0x3ad   :  { %1203 = vmatpush1.bf16.msra.mxu0 %v2431_v38  ;;  %1244 = vmatpush1.bf16.msra.mxu1 %v2433_v39 }
 0x3ae   :  { %1204 = vmatprep.subr.bf16.mxu0 %v2437_v40  ;;  %1245 = vmatprep.subr.bf16.mxu1 %v2439_v41 }
 0x3af   :  { %1234 = vmatprep.mubr.bf16.mxu0 %v3031_v22  ;;  %1275 = vmatprep.mubr.bf16.mxu1 %v3031_v22 }
 0x3b1   :  { %1205 = vmatpush1.bf16.msra.mxu0 %v2441_v42  ;;  %1246 = vmatpush1.bf16.msra.mxu1 %v2443_v43 }
 0x3b2   :  { %1206 = vmatprep.subr.bf16.mxu0 %v2447_v46  ;;  %1247 = vmatprep.subr.bf16.mxu1 %v2451_v47 }
 0x3b5   :  { %1207 = vmatpush1.bf16.msra.mxu0 %v2455_v49  ;;  %1248 = vmatpush1.bf16.msra.mxu1 %v2457_v50 }
 0x3b6   :  { %1208 = vmatprep.subr.bf16.mxu0 %v2461_v51  ;;  %1249 = vmatprep.subr.bf16.mxu1 %v2465_v52 }
 0x3b9   :  { %1209 = vmatpush1.bf16.msra.mxu0 %v2467_v53  ;;  %1250 = vmatpush1.bf16.msra.mxu1 %v2469_v54 }
 0x3ba   :  { %1210 = vmatprep.subr.bf16.mxu0 %v2475_v57  ;;  %1251 = vmatprep.subr.bf16.mxu1 %v2477_v58 }
 0x3bd   :  { %1211 = vmatpush1.bf16.msra.mxu0 %v2483_v60  ;;  %1252 = vmatpush1.bf16.msra.mxu1 %v2485_v61 }
 0x3be   :  { %1212 = vmatprep.subr.bf16.mxu0 %v2489_v62  ;;  %1253 = vmatprep.subr.bf16.mxu1 %v2491_v63 }
 0x3c1   :  { %1213 = vmatpush1.bf16.msra.mxu0 %v2493_v1  ;;  %1254 = vmatpush1.bf16.msra.mxu1 %v2497_v2 }
 0x3c2   :  { %1214 = vmatprep.subr.bf16.mxu0 %v2501_v5  ;;  %1255 = vmatprep.subr.bf16.mxu1 %v2503_v6 }
 0x3c5   :  { %1215 = vmatpush1.bf16.msra.mxu0 %v2509_v8  ;;  %1256 = vmatpush1.bf16.msra.mxu1 %v2511_v9 }
 0x3c6   :  { %1216 = vmatprep.subr.bf16.mxu0 %v2515_v10  ;;  %1257 = vmatprep.subr.bf16.mxu1 %v2517_v11 }
 0x3c9   :  { %1217 = vmatpush1.bf16.msra.mxu0 %v2521_v12  ;;  %1258 = vmatpush1.bf16.msra.mxu1 %v2523_v13 }
 0x3ca   :  { %1326 = vmatprep.subr.bf16.mxu0 %v2427_v35  ;;  %1367 = vmatprep.subr.bf16.mxu1 %v2429_v36 }
 0x47f   :  { %v1112_v55 = vpop.f32.mrb[28].mxu0  ;;  %v1153_v24 = vpop.f32.mrb[28].mxu1 }
 0x480   :  { %v1160_v25 = vadd.f32 %v1112_v55, %v3033_v23  ;;  %v1162_v26 = vadd.f32 %v1153_v24, %v3034_v27  ;;  %v1114_v28 = vpop.f32.mrb[29].mxu0  ;;  %v1155_v0 = vpop.f32.mrb[29].mxu1 }
 0x481   :  { %v1161_v30 = vadd.f32 %v1114_v28, %v3035_v29  ;;  %v1163_v18 = vadd.f32 %v1155_v0, %v3036_v44  ;;  %v1116_v7 = vpop.f32.mrb[30].mxu0  ;;  %v1157_v33 = vpop.f32.mrb[30].mxu1 }
 0x482   :  { %v1821_v37 = vmul.f32 -1.442695, %v1160_v25  ;;  %v1117_v45 = vpop.f32.mrb[31].mxu0  ;;  %v1158_v34 = vpop.f32.mrb[31].mxu1  ;;  %v1823_v36 = vmul.f32 -1.442695, %v1162_v26 }
 0x483   :  { %v1822_v35 = vmul.f32 -1.442695, %v1161_v30 }
 0x484   :  { %1993 = vpow2.f32 %v1821_v37 }
 0x485   :  { %1995 = vpow2.f32 %v1822_v35  ;;  %v2827_v35 = vld [vmem:[#allocation13] ss:$16 sps:$4 sm:$0xff]  }
 0x486   :  { %1997 = vpow2.f32 %v1823_v36  ;;  %v2830_v36 = vld [vmem:[#allocation13 + $0x8] ss:$16 sps:$4 sm:$0xff]  }
 0x48e   :  { %v1994_v59 = vpop.eup %1993 }
 0x48f   :  { %v1167_v4 = vadd.f32 1.0, %v1994_v59  ;;  %v1996_v14 = vpop.eup %1995  ;;  %v2833_v59 = vld [vmem:[#allocation13 + $0x24] ss:$16 sps:$4 sm:$0xff]  }
 0x490   :  { %v1174_v48 = vadd.f32 1.0, %v1996_v14  ;;  %v1998_v16 = vpop.eup %1997  ;;  %v2841_v14 = vld [vmem:[#allocation13 + $0x20] ss:$16 sps:$4 sm:$0xff]  }
 0x491   :  { %1999 = vrcp.f32 %v1167_v4  ;;  %v1183_v21 = vadd.f32 1.0, %v1998_v16  ;;  %v2836_v4 = vld [vmem:[#allocation13 + $0x2c] ss:$16 sps:$4 sm:$0xff]   ;;  %v2847_v16 = vld [vmem:[#allocation13 + $0x44] ss:$16 sps:$4 sm:$0xff]  }
 0x492   :  { %2001 = vtanh.f32 %v1163_v18 }
 0x493   :  { %2003 = vrcp.f32 %v1174_v48  ;;  %v2844_v48 = vld [vmem:[#allocation13 + $0x28] ss:$16 sps:$4 sm:$0xff]  }
 0x494   :  { %2005 = vrcp.f32 %v1183_v21  ;;  %v2862_v21 = vld [vmem:[#allocation13 + $0x6c] ss:$16 sps:$4 sm:$0xff]  }
 0x49b   :  { %v2000_v31 = vpop.eup %1999 }
 0x49c   :  { %v2002_v3 = vpop.eup %2001  ;;  %v1170_v19 = vmul.f32 %v2000_v31, %v2736_v17  ;;  %v2850_v31 = vld [vmem:[#allocation13 + $0x4c] ss:$16 sps:$4 sm:$0xff]  }
 0x49d   :  { %v2004_v15 = vpop.eup %2003 }
 0x49e   :  { %v1178_v32 = vmul.f32 %v2004_v15, %v2002_v3  ;;  %v2006_v56 = vpop.eup %2005  ;;  %v2853_v3 = vld [vmem:[#allocation13 + $0x40] ss:$16 sps:$4 sm:$0xff]   ;;  %v2859_v15 = vld [vmem:[#allocation13 + $0x64] ss:$16 sps:$4 sm:$0xff]  }
 0x4a0   :  { %v2778_v20 = vadd.f32 %v1178_v32, %v1170_v19  ;;  %v2856_v19 = vld [vmem:[#allocation13 + $0x48] ss:$16 sps:$4 sm:$0xff]   ;;  %v2865_v32 = vld [vmem:[#allocation13 + $0x60] ss:$16 sps:$4 sm:$0xff]  }
 0x4a2   :  { %2007 = vtanh.f32 %v2778_v20 }
 0x4ac   :  { %v2008_v55 = vpop.eup %2007 }
 0x4ad   :  { %v1187_v24 = vmul.f32 %v2008_v55, %v2006_v56  ;;  %v2871_v56 = vld [vmem:[#allocation13 + $0x84] ss:$16 sps:$4 sm:$0xff]   ;;  %v2874_v55 = vld [vmem:[#allocation13 + $0x8c] ss:$16 sps:$4 sm:$0xff]  }
 0x4af   :  { %1191 = vst [vmem:[#allocation14 + $0x18] sm:$0xff] %v1187_v24  ;;  %v1201_v23 = vpack.c.bf16 %v1187_v24, %v1187_v24  ;;  %v2877_v24 = vld [vmem:[#allocation13 + $0x80] ss:$16 sps:$4 sm:$0xff]  }
 0x4b1   :  { %1235 = vmatmul.mubr.bf16.vlgmr.msra.gmra.mrb[32].mxu0 %v1201_v23  ;;  %1276 = vmatmul.mubr.bf16.vlgmr.msra.gmra.mrb[32].mxu1 %v1201_v23  ;;  %v2880_v23 = vld [vmem:[#allocation13 + $0x88] ss:$16 sps:$4 sm:$0xff]  }
 0x4b2   :  { %1327 = vmatpush1.bf16.msra.mxu0 %v2431_v38  ;;  %1368 = vmatpush1.bf16.msra.mxu1 %v2433_v39  ;;  %v2813_v38 = vld [vmem:[#allocation13 + $0x4] ss:$16 sps:$4 sm:$0xff]   ;;  %v2816_v39 = vld [vmem:[#allocation13 + $0xc] ss:$16 sps:$4 sm:$0xff]  }
 0x4b3   :  { %1328 = vmatprep.subr.bf16.mxu0 %v2437_v40  ;;  %1369 = vmatprep.subr.bf16.mxu1 %v2439_v41 }
 0x4b4   :  { %1358 = vmatprep.mubr.bf16.mxu0 %v3031_v22  ;;  %1399 = vmatprep.mubr.bf16.mxu1 %v3031_v22 }
 0x4b6   :  { %1329 = vmatpush1.bf16.msra.mxu0 %v2441_v42  ;;  %1370 = vmatpush1.bf16.msra.mxu1 %v2443_v43  ;;  %v3037_v42 = vld [vmem:[#allocation28_spill] sm:$0xff] }
 0x4b7   :  { %1330 = vmatprep.subr.bf16.mxu0 %v2447_v46  ;;  %1371 = vmatprep.subr.bf16.mxu1 %v2451_v47  ;;  %v3038_v46 = vld [vmem:[#allocation29_spill] sm:$0xff] }
 0x4ba   :  { %1331 = vmatpush1.bf16.msra.mxu0 %v2455_v49  ;;  %1372 = vmatpush1.bf16.msra.mxu1 %v2457_v50 }
 0x4bb   :  { %1332 = vmatprep.subr.bf16.mxu0 %v2461_v51  ;;  %1373 = vmatprep.subr.bf16.mxu1 %v2465_v52  ;;  %v3039_v51 = vld [vmem:[#allocation30_spill] sm:$0xff] }
 0x4be   :  { %1333 = vmatpush1.bf16.msra.mxu0 %v2467_v53  ;;  %1374 = vmatpush1.bf16.msra.mxu1 %v2469_v54  ;;  %v3040_v53 = vld [vmem:[#allocation31_spill] sm:$0xff] }
 0x4bf   :  { %1334 = vmatprep.subr.bf16.mxu0 %v2475_v57  ;;  %1375 = vmatprep.subr.bf16.mxu1 %v2477_v58 }
 0x4c2   :  { %1335 = vmatpush1.bf16.msra.mxu0 %v2483_v60  ;;  %1376 = vmatpush1.bf16.msra.mxu1 %v2485_v61 }
 0x4c3   :  { %1336 = vmatprep.subr.bf16.mxu0 %v2489_v62  ;;  %1377 = vmatprep.subr.bf16.mxu1 %v2491_v63 }
 0x4c6   :  { %1337 = vmatpush1.bf16.msra.mxu0 %v2493_v1  ;;  %1378 = vmatpush1.bf16.msra.mxu1 %v2497_v2 }
 0x4c7   :  { %1338 = vmatprep.subr.bf16.mxu0 %v2501_v5  ;;  %1379 = vmatprep.subr.bf16.mxu1 %v2503_v6 }
 0x4ca   :  { %1339 = vmatpush1.bf16.msra.mxu0 %v2509_v8  ;;  %1380 = vmatpush1.bf16.msra.mxu1 %v2511_v9 }
 0x4cb   :  { %1340 = vmatprep.subr.bf16.mxu0 %v2515_v10  ;;  %1381 = vmatprep.subr.bf16.mxu1 %v2517_v11 }
 0x4ce   :  { %1341 = vmatpush1.bf16.msra.mxu0 %v2521_v12  ;;  %1382 = vmatpush1.bf16.msra.mxu1 %v2523_v13 }
 0x4cf   :  { %1450 = vmatprep.subr.bf16.mxu0 %v2813_v38  ;;  %1491 = vmatprep.subr.bf16.mxu1 %v2816_v39 }
 0x584   :  { %v1236_v40 = vpop.f32.mrb[32].mxu0  ;;  %v1277_v41 = vpop.f32.mrb[32].mxu1 }
 0x585   :  { %v1284_v43 = vadd.f32 %v1236_v40, %v3037_v42  ;;  %v1286_v47 = vadd.f32 %v1277_v41, %v3038_v46  ;;  %v1238_v49 = vpop.f32.mrb[33].mxu0  ;;  %v1279_v50 = vpop.f32.mrb[33].mxu1  ;;  %v2883_v40 = vld [vmem:[#allocation13 + $0xa4] ss:$16 sps:$4 sm:$0xff]   ;;  %v2886_v41 = vld [vmem:[#allocation13 + $0xac] ss:$16 sps:$4 sm:$0xff]  }
 0x586   :  { %v1285_v52 = vadd.f32 %v1238_v49, %v3039_v51  ;;  %v1287_v54 = vadd.f32 %v1279_v50, %v3040_v53  ;;  %v1240_v57 = vpop.f32.mrb[34].mxu0  ;;  %v1281_v58 = vpop.f32.mrb[34].mxu1  ;;  %v2889_v42 = vld [vmem:[#allocation13 + $0xa0] ss:$16 sps:$4 sm:$0xff]   ;;  %v3043_v51 = vld [vmem:[#allocation34_spill] sm:$0xff] }
 0x587   :  { %v1824_v60 = vmul.f32 -1.442695, %v1284_v43  ;;  %v1241_v61 = vpop.f32.mrb[35].mxu0  ;;  %v1282_v62 = vpop.f32.mrb[35].mxu1  ;;  %v1826_v1 = vmul.f32 -1.442695, %v1286_v47 }
 0x588   :  { %v1825_v63 = vmul.f32 -1.442695, %v1285_v52  ;;  %v2892_v43 = vld [vmem:[#allocation13 + $0xa8] ss:$16 sps:$4 sm:$0xff]   ;;  %v3042_v49 = vld [vmem:[#allocation33_spill] sm:$0xff]  ;;  %v3044_v52 = vld [vmem:[#allocation35_spill] sm:$0xff] }
 0x589   :  { %2009 = vpow2.f32 %v1824_v60  ;;  %v3041_v47 = vld [vmem:[#allocation32_spill] sm:$0xff] }
 0x58a   :  { %2011 = vpow2.f32 %v1825_v63 }
 0x58b   :  { %2013 = vpow2.f32 %v1826_v1 }
 0x593   :  { %v2010_v2 = vpop.eup %2009 }
 0x594   :  { %v1291_v17 = vadd.f32 1.0, %v2010_v2  ;;  %v2012_v25 = vpop.eup %2011 }
 0x595   :  { %v1298_v27 = vadd.f32 1.0, %v2012_v25  ;;  %v2014_v26 = vpop.eup %2013 }
 0x596   :  { %2015 = vrcp.f32 %v1291_v17  ;;  %v1307_v44 = vadd.f32 1.0, %v2014_v26 }
 0x597   :  { %2017 = vtanh.f32 %v1287_v54 }
 0x598   :  { %2019 = vrcp.f32 %v1298_v27 }
 0x599   :  { %2021 = vrcp.f32 %v1307_v44 }
 0x5a0   :  { %v2016_v28 = vpop.eup %2015 }
 0x5a1   :  { %v2018_v0 = vpop.eup %2017  ;;  %v1294_v29 = vmul.f32 %v2016_v28, %v2778_v20  ;;  %v2868_v20 = vld [vmem:[#allocation13 + $0x68] ss:$16 sps:$4 sm:$0xff]  }
 0x5a2   :  { %v2020_v30 = vpop.eup %2019 }
 0x5a3   :  { %v1302_v18 = vmul.f32 %v2020_v30, %v2018_v0  ;;  %v2022_v33 = vpop.eup %2021 }
 0x5a5   :  { %v2824_v7 = vadd.f32 %v1302_v18, %v1294_v29  ;;  %v2098_v18 = vld [vmem:[#allocation13 + $0xcc] ss:$16 sps:$4 sm:$0xff]  }
 0x5a7   :  { %2023 = vtanh.f32 %v2824_v7 }
 0x5b1   :  { %v2024_v37 = vpop.eup %2023 }
 0x5b2   :  { %v1311_v45 = vmul.f32 %v2024_v37, %v2022_v33  ;;  %v2100_v33 = vld [vmem:[#allocation13 + $0xc8] ss:$16 sps:$4 sm:$0xff]   ;;  %v2101_v37 = vld [vmem:[#allocation13 + $0xe4] ss:$16 sps:$4 sm:$0xff]  }
 0x5b4   :  { %1315 = vst [vmem:[#allocation14 + $0x20] sm:$0xff] %v1311_v45  ;;  %v1325_v34 = vpack.c.bf16 %v1311_v45, %v1311_v45  ;;  %v2102_v45 = vld [vmem:[#allocation13 + $0xec] ss:$16 sps:$4 sm:$0xff]  }
 0x5b6   :  { %1359 = vmatmul.mubr.bf16.vlgmr.msra.gmra.mrb[36].mxu0 %v1325_v34  ;;  %1400 = vmatmul.mubr.bf16.vlgmr.msra.gmra.mrb[36].mxu1 %v1325_v34  ;;  %v2103_v34 = vld [vmem:[#allocation13 + $0xe0] ss:$16 sps:$4 sm:$0xff]  }
 0x5b7   :  { %1451 = vmatpush1.bf16.msra.mxu0 %v2827_v35  ;;  %1492 = vmatpush1.bf16.msra.mxu1 %v2830_v36 }
 0x5b8   :  { %1452 = vmatprep.subr.bf16.mxu0 %v2833_v59  ;;  %1493 = vmatprep.subr.bf16.mxu1 %v2836_v4 }
 0x5b9   :  { %1482 = vmatprep.mubr.bf16.mxu0 %v3031_v22  ;;  %1523 = vmatprep.mubr.bf16.mxu1 %v3031_v22 }
 0x5bb   :  { %1453 = vmatpush1.bf16.msra.mxu0 %v2841_v14  ;;  %1494 = vmatpush1.bf16.msra.mxu1 %v2844_v48 }
 0x5bc   :  { %1454 = vmatprep.subr.bf16.mxu0 %v2847_v16  ;;  %1495 = vmatprep.subr.bf16.mxu1 %v2850_v31 }
 0x5bf   :  { %1455 = vmatpush1.bf16.msra.mxu0 %v2853_v3  ;;  %1496 = vmatpush1.bf16.msra.mxu1 %v2856_v19 }
 0x5c0   :  { %1456 = vmatprep.subr.bf16.mxu0 %v2859_v15  ;;  %1497 = vmatprep.subr.bf16.mxu1 %v2862_v21 }
 0x5c3   :  { %1457 = vmatpush1.bf16.msra.mxu0 %v2865_v32  ;;  %1498 = vmatpush1.bf16.msra.mxu1 %v2868_v20 }
 0x5c4   :  { %1458 = vmatprep.subr.bf16.mxu0 %v2871_v56  ;;  %1499 = vmatprep.subr.bf16.mxu1 %v2874_v55 }
 0x5c7   :  { %1459 = vmatpush1.bf16.msra.mxu0 %v2877_v24  ;;  %1500 = vmatpush1.bf16.msra.mxu1 %v2880_v23 }
 0x5c8   :  { %1460 = vmatprep.subr.bf16.mxu0 %v2883_v40  ;;  %1501 = vmatprep.subr.bf16.mxu1 %v2886_v41 }
 0x5cb   :  { %1461 = vmatpush1.bf16.msra.mxu0 %v2889_v42  ;;  %1502 = vmatpush1.bf16.msra.mxu1 %v2892_v43 }
 0x5cc   :  { %1462 = vmatprep.subr.bf16.mxu0 %v2501_v5  ;;  %1503 = vmatprep.subr.bf16.mxu1 %v2503_v6 }
 0x5cf   :  { %1463 = vmatpush1.bf16.msra.mxu0 %v2509_v8  ;;  %1504 = vmatpush1.bf16.msra.mxu1 %v2511_v9 }
 0x5d0   :  { %1464 = vmatprep.subr.bf16.mxu0 %v2515_v10  ;;  %1505 = vmatprep.subr.bf16.mxu1 %v2517_v11 }
 0x5d3   :  { %1465 = vmatpush1.bf16.msra.mxu0 %v2521_v12  ;;  %1506 = vmatpush1.bf16.msra.mxu1 %v2523_v13 }
 0x5d4   :  { %1574 = vmatprep.subr.bf16.mxu0 %v2813_v38  ;;  %1615 = vmatprep.subr.bf16.mxu1 %v2816_v39 }
 0x689   :  { %v1360_v46 = vpop.f32.mrb[36].mxu0  ;;  %v1401_v5 = vpop.f32.mrb[36].mxu1 }
 0x68a   :  { %v1408_v6 = vadd.f32 %v1360_v46, %v3041_v47  ;;  %v1410_v8 = vadd.f32 %v1401_v5, %v3042_v49  ;;  %v1362_v50 = vpop.f32.mrb[37].mxu0  ;;  %v1403_v9 = vpop.f32.mrb[37].mxu1 }
 0x68b   :  { %v1409_v10 = vadd.f32 %v1362_v50, %v3043_v51  ;;  %v1411_v11 = vadd.f32 %v1403_v9, %v3044_v52  ;;  %v1364_v53 = vpop.f32.mrb[38].mxu0  ;;  %v1405_v12 = vpop.f32.mrb[38].mxu1 }
 0x68c   :  { %v1827_v54 = vmul.f32 -1.442695, %v1408_v6  ;;  %v1365_v13 = vpop.f32.mrb[39].mxu0  ;;  %v1406_v57 = vpop.f32.mrb[39].mxu1  ;;  %v1829_v39 = vmul.f32 -1.442695, %v1410_v8 }
 0x68d   :  { %v1828_v38 = vmul.f32 -1.442695, %v1409_v10  ;;  %v3049_v57 = vld [vmem:[#allocation40_spill] sm:$0xff] }
 0x68e   :  { %2025 = vpow2.f32 %v1827_v54 }
 0x68f   :  { %2027 = vpow2.f32 %v1828_v38 }
 0x690   :  { %2029 = vpow2.f32 %v1829_v39  ;;  %v3050_v39 = vld [vmem:[#allocation41_spill] sm:$0xff] }
 0x698   :  { %v2026_v58 = vpop.eup %2025 }
 0x699   :  { %v1415_v60 = vadd.f32 1.0, %v2026_v58  ;;  %v2028_v61 = vpop.eup %2027 }
 0x69a   :  { %v1422_v62 = vadd.f32 1.0, %v2028_v61  ;;  %v2030_v63 = vpop.eup %2029 }
 0x69b   :  { %2031 = vrcp.f32 %v1415_v60  ;;  %v1431_v27 = vadd.f32 1.0, %v2030_v63 }
 0x69c   :  { %2033 = vtanh.f32 %v1411_v11 }
 0x69d   :  { %2035 = vrcp.f32 %v1422_v62  ;;  %v3051_v62 = vld [vmem:[#allocation42_spill] sm:$0xff] }
 0x69e   :  { %2037 = vrcp.f32 %v1431_v27 }
 0x6a5   :  { %v2032_v1 = vpop.eup %2031 }
 0x6a6   :  { %v2034_v2 = vpop.eup %2033  ;;  %v1418_v17 = vmul.f32 %v2032_v1, %v2824_v7  ;;  %v2099_v7 = vld [vmem:[#allocation13 + $0xc0] ss:$16 sps:$4 sm:$0xff]  }
 0x6a7   :  { %v2036_v25 = vpop.eup %2035  ;;  %v3052_v1 = vld [vmem:[#allocation43_spill] sm:$0xff] }
 0x6a8   :  { %v1426_v26 = vmul.f32 %v2036_v25, %v2034_v2  ;;  %v2038_v0 = vpop.eup %2037 }
 0x6aa   :  { %v2910_v28 = vadd.f32 %v1426_v26, %v1418_v17 }
 0x6ac   :  { %2039 = vtanh.f32 %v2910_v28 }
 0x6b6   :  { %v2040_v29 = vpop.eup %2039 }
 0x6b7   :  { %v1435_v30 = vmul.f32 %v2040_v29, %v2038_v0 }
 0x6b9   :  { %1439 = vst [vmem:[#allocation14 + $0x28] sm:$0xff] %v1435_v30  ;;  %v1449_v44 = vpack.c.bf16 %v1435_v30, %v1435_v30 }
 0x6bb   :  { %1483 = vmatmul.mubr.bf16.vlgmr.msra.gmra.mrb[40].mxu0 %v1449_v44  ;;  %1524 = vmatmul.mubr.bf16.vlgmr.msra.gmra.mrb[40].mxu1 %v1449_v44 }
 0x6bc   :  { %1575 = vmatpush1.bf16.msra.mxu0 %v2827_v35  ;;  %1616 = vmatpush1.bf16.msra.mxu1 %v2830_v36  ;;  %v2104_v35 = vld [vmem:[#allocation13 + $0xe8] ss:$16 sps:$4 sm:$0xff]  }
 0x6bd   :  { %1576 = vmatprep.subr.bf16.mxu0 %v2833_v59  ;;  %1617 = vmatprep.subr.bf16.mxu1 %v2836_v4  ;;  %v3045_v4 = vld [vmem:[#allocation36_spill] sm:$0xff] }
 0x6be   :  { %1606 = vmatprep.mubr.bf16.mxu0 %v3031_v22  ;;  %1647 = vmatprep.mubr.bf16.mxu1 %v3031_v22  ;;  %v2097_v22 = vld [vmem:[#allocation13 + $0xc4] ss:$16 sps:$4 sm:$0xff]  }
 0x6c0   :  { %1577 = vmatpush1.bf16.msra.mxu0 %v2841_v14  ;;  %1618 = vmatpush1.bf16.msra.mxu1 %v2844_v48  ;;  %v3046_v48 = vld [vmem:[#allocation37_spill] sm:$0xff] }
 0x6c1   :  { %1578 = vmatprep.subr.bf16.mxu0 %v2847_v16  ;;  %1619 = vmatprep.subr.bf16.mxu1 %v2850_v31 }
 0x6c4   :  { %1579 = vmatpush1.bf16.msra.mxu0 %v2853_v3  ;;  %1620 = vmatpush1.bf16.msra.mxu1 %v2856_v19  ;;  %v3047_v19 = vld [vmem:[#allocation38_spill] sm:$0xff] }
 0x6c5   :  { %1580 = vmatprep.subr.bf16.mxu0 %v2859_v15  ;;  %1621 = vmatprep.subr.bf16.mxu1 %v2862_v21  ;;  %v3048_v21 = vld [vmem:[#allocation39_spill] sm:$0xff] }
 0x6c8   :  { %1581 = vmatpush1.bf16.msra.mxu0 %v2865_v32  ;;  %1622 = vmatpush1.bf16.msra.mxu1 %v2868_v20 }
 0x6c9   :  { %1582 = vmatprep.subr.bf16.mxu0 %v2871_v56  ;;  %1623 = vmatprep.subr.bf16.mxu1 %v2874_v55 }
 0x6cc   :  { %1583 = vmatpush1.bf16.msra.mxu0 %v2877_v24  ;;  %1624 = vmatpush1.bf16.msra.mxu1 %v2880_v23 }
 0x6cd   :  { %1584 = vmatprep.subr.bf16.mxu0 %v2883_v40  ;;  %1625 = vmatprep.subr.bf16.mxu1 %v2886_v41 }
 0x6d0   :  { %1585 = vmatpush1.bf16.msra.mxu0 %v2889_v42  ;;  %1626 = vmatpush1.bf16.msra.mxu1 %v2892_v43 }
 0x6d1   :  { %1586 = vmatprep.subr.bf16.mxu0 %v2097_v22  ;;  %1627 = vmatprep.subr.bf16.mxu1 %v2098_v18 }
 0x6d4   :  { %1587 = vmatpush1.bf16.msra.mxu0 %v2099_v7  ;;  %1628 = vmatpush1.bf16.msra.mxu1 %v2100_v33 }
 0x6d5   :  { %1588 = vmatprep.subr.bf16.mxu0 %v2101_v37  ;;  %1629 = vmatprep.subr.bf16.mxu1 %v2102_v45 }
 0x6d8   :  { %1589 = vmatpush1.bf16.msra.mxu0 %v2103_v34  ;;  %1630 = vmatpush1.bf16.msra.mxu1 %v2104_v35 }
 0x78e   :  { %v1484_v36 = vpop.f32.mrb[40].mxu0  ;;  %v1525_v59 = vpop.f32.mrb[40].mxu1 }
 0x78f   :  { %v1532_v14 = vadd.f32 %v1484_v36, %v3045_v4  ;;  %v1534_v16 = vadd.f32 %v1525_v59, %v3046_v48  ;;  %v1486_v31 = vpop.f32.mrb[41].mxu0  ;;  %v1527_v3 = vpop.f32.mrb[41].mxu1 }
 0x790   :  { %v1533_v15 = vadd.f32 %v1486_v31, %v3047_v19  ;;  %v1535_v32 = vadd.f32 %v1527_v3, %v3048_v21  ;;  %v1488_v20 = vpop.f32.mrb[42].mxu0  ;;  %v1529_v56 = vpop.f32.mrb[42].mxu1 }
 0x791   :  { %v1830_v55 = vmul.f32 -1.442695, %v1532_v14  ;;  %v1489_v24 = vpop.f32.mrb[43].mxu0  ;;  %v1530_v23 = vpop.f32.mrb[43].mxu1  ;;  %v1832_v41 = vmul.f32 -1.442695, %v1534_v16 }
 0x792   :  { %v1831_v40 = vmul.f32 -1.442695, %v1533_v15 }
 0x793   :  { %2041 = vpow2.f32 %v1830_v55 }
 0x794   :  { %2043 = vpow2.f32 %v1831_v40 }
 0x795   :  { %2045 = vpow2.f32 %v1832_v41 }
 0x79d   :  { %v2042_v42 = vpop.eup %2041 }
 0x79e   :  { %v1539_v43 = vadd.f32 1.0, %v2042_v42  ;;  %v2044_v46 = vpop.eup %2043 }
 0x79f   :  { %v1546_v5 = vadd.f32 1.0, %v2044_v46  ;;  %v2046_v47 = vpop.eup %2045 }
 0x7a0   :  { %2047 = vrcp.f32 %v1539_v43  ;;  %v1555_v9 = vadd.f32 1.0, %v2046_v47 }
 0x7a1   :  { %2049 = vtanh.f32 %v1535_v32 }
 0x7a2   :  { %2051 = vrcp.f32 %v1546_v5 }
 0x7a3   :  { %2053 = vrcp.f32 %v1555_v9 }
 0x7aa   :  { %v2048_v6 = vpop.eup %2047 }
 0x7ab   :  { %v2050_v49 = vpop.eup %2049  ;;  %v1542_v8 = vmul.f32 %v2048_v6, %v2910_v28 }
 0x7ac   :  { %v2052_v50 = vpop.eup %2051 }
 0x7ad   :  { %v1550_v51 = vmul.f32 %v2052_v50, %v2050_v49  ;;  %v2054_v52 = vpop.eup %2053 }
 0x7af   :  { %v1551_v10 = vadd.f32 %v1550_v51, %v1542_v8 }
 0x7b1   :  { %2055 = vtanh.f32 %v1551_v10 }
 0x7bb   :  { %v2056_v11 = vpop.eup %2055 }
 0x7bc   :  { %v1559_v53 = vmul.f32 %v2056_v11, %v2054_v52 }
 0x7be   :  { %1563 = vst [vmem:[#allocation14 + $0x30] sm:$0xff] %v1559_v53  ;;  %v1573_v12 = vpack.c.bf16 %v1559_v53, %v1559_v53 }
 0x7c0   :  { %1607 = vmatmul.mubr.bf16.vlgmr.msra.gmra.mrb[44].mxu0 %v1573_v12  ;;  %1648 = vmatmul.mubr.bf16.vlgmr.msra.gmra.mrb[44].mxu1 %v1573_v12 }
 0x893   :  { %v1608_v54 = vpop.f32.mrb[44].mxu0  ;;  %v1649_v13 = vpop.f32.mrb[44].mxu1 }
 0x894   :  { %v1656_v38 = vadd.f32 %v1608_v54, %v3049_v57  ;;  %v1658_v58 = vadd.f32 %v1649_v13, %v3050_v39  ;;  %v1610_v60 = vpop.f32.mrb[45].mxu0  ;;  %v1651_v61 = vpop.f32.mrb[45].mxu1 }
 0x895   :  { %v1657_v63 = vadd.f32 %v1610_v60, %v3051_v62  ;;  %v1659_v2 = vadd.f32 %v1651_v61, %v3052_v1  ;;  %v1612_v17 = vpop.f32.mrb[46].mxu0  ;;  %v1653_v25 = vpop.f32.mrb[46].mxu1 }
 0x896   :  { %v1833_v27 = vmul.f32 -1.442695, %v1656_v38  ;;  %v1613_v26 = vpop.f32.mrb[47].mxu0  ;;  %v1654_v28 = vpop.f32.mrb[47].mxu1  ;;  %v1835_v29 = vmul.f32 -1.442695, %v1658_v58 }
 0x897   :  { %v1834_v0 = vmul.f32 -1.442695, %v1657_v63 }
 0x898   :  { %2057 = vpow2.f32 %v1833_v27 }
 0x899   :  { %2059 = vpow2.f32 %v1834_v0 }
 0x89a   :  { %2061 = vpow2.f32 %v1835_v29 }
 0x8a2   :  { %v2058_v30 = vpop.eup %2057 }
 0x8a3   :  { %v1663_v44 = vadd.f32 1.0, %v2058_v30  ;;  %v2060_v22 = vpop.eup %2059 }
 0x8a4   :  { %v1670_v18 = vadd.f32 1.0, %v2060_v22  ;;  %v2062_v7 = vpop.eup %2061 }
 0x8a5   :  { %2063 = vrcp.f32 %v1663_v44  ;;  %v1679_v35 = vadd.f32 1.0, %v2062_v7 }
 0x8a6   :  { %2065 = vtanh.f32 %v1659_v2 }
 0x8a7   :  { %2067 = vrcp.f32 %v1670_v18 }
 0x8a8   :  { %2069 = vrcp.f32 %v1679_v35 }
 0x8af   :  { %v2064_v33 = vpop.eup %2063 }
 0x8b0   :  { %v2066_v37 = vpop.eup %2065  ;;  %v1666_v45 = vmul.f32 %v2064_v33, %v1551_v10 }
 0x8b1   :  { %v2068_v34 = vpop.eup %2067 }
 0x8b2   :  { %v1674_v36 = vmul.f32 %v2068_v34, %v2066_v37  ;;  %v2070_v4 = vpop.eup %2069 }
 0x8b4   :  { %v1675_v59 = vadd.f32 %v1674_v36, %v1666_v45 }
 0x8b6   :  { %1694 = vst [vmem:[#allocation17] sm:$0xff] %v1675_v59  ;;  %2071 = vtanh.f32 %v1675_v59 }
 0x8c0   :  { %v2072_v14 = vpop.eup %2071 }
 0x8c1   :  { %v1683_v48 = vmul.f32 %v2072_v14, %v2070_v4 }
 0x8c3   :  { %1687 = vst [vmem:[#allocation14 + $0x38] sm:$0xff] %v1683_v48  ;;  %1692 = vst [vmem:[#allocation15] sm:$0xff] %v1683_v48 }
 0x8c4   :  { %2226 = shalt.err (!%p2223_p2)
}
 0x8c5   :  { %s2227_s11 = scalar_lea.hbm %s3006_s7, 128 }
 0x8c6   :  { %p2228_p3 = scmp.ne.s32.totalorder %s3006_s7, %s2227_s11  ;;  %p2231_p4 = scmp.lt.u32.totalorder %s2227_s11, %s3006_s7 }
 0x8c8   :  { %p2233_p5 = pnand %p2231_p4, %p2228_p3 }
 0x8ca   :  { %2236 = shalt.err (!%p2233_p5)
}
 0x8cb   :  { %1716 = dma.vmem_to_hbm [thread:$0]  %s1714_s27, 128, %s3006_s7, [#allocation16]  }
 0x8cc   :  { %s2237_s16 = scalar_lea.vmem %s2946_s24, 1024  ;;  %p2242_p7 = scmp.lt.s32.totalorder %s2946_s24, %s2946_s24 }
 0x8cd   :  { %p2238_p6 = scmp.ne.s32.totalorder %s2946_s24, %s2237_s16  ;;  %p2243_p8 = scmp.lt.s32.totalorder %s2237_s16, %s2237_s16 }
 0x8cf   :  { %p2244_p9 = por %p2243_p8, %p2242_p7 }
 0x8d1   :  { %p2245_p10 = pnand %p2244_p9, %p2238_p6 }
 0x8d3   :  { %2248 = shalt.err (!%p2245_p10)
}
 0x8d4   :  { %s2249_s19 = scalar_lea.hbm %s3005_s6, 1024 }
 0x8d5   :  { %p2250_p11 = scmp.ne.s32.totalorder %s3005_s6, %s2249_s19  ;;  %p2253_p12 = scmp.lt.u32.totalorder %s2249_s19, %s3005_s6 }
 0x8d7   :  { %p2255_p13 = pnand %p2253_p12, %p2250_p11 }
 0x8d9   :  { %2258 = shalt.err (!%p2255_p13)
}
 0x8da   :  { %1706 = dma.vmem_to_hbm [thread:$0]  %s2946_s24, 1024, %s3005_s6, [#allocation7], %s2296_s3, %s2296_s3, %s2297_s30  }
 0x8db   :  { %s2259_s1 = scalar_lea.vmem %s2948_s26, 128  ;;  %p2264_p1 = scmp.lt.s32.totalorder %s2948_s26, %s2948_s26 }
 0x8dc   :  { %p2260_p0 = scmp.ne.s32.totalorder %s2948_s26, %s2259_s1  ;;  %p2265_p2 = scmp.lt.s32.totalorder %s2259_s1, %s2259_s1 }
 0x8de   :  { %p2266_p3 = por %p2265_p2, %p2264_p1 }
 0x8e0   :  { %p2267_p4 = pnand %p2266_p3, %p2260_p0 }
 0x8e2   :  { %2270 = shalt.err (!%p2267_p4)
}
 0x8e3   :  { %s2271_s23 = scalar_lea.hbm %s3007_s8, 128 }
 0x8e4   :  { %p2272_p5 = scmp.ne.s32.totalorder %s3007_s8, %s2271_s23  ;;  %p2275_p6 = scmp.lt.u32.totalorder %s2271_s23, %s3007_s8 }
 0x8e6   :  { %p2277_p7 = pnand %p2275_p6, %p2272_p5 }
 0x8e8   :  { %2280 = shalt.err (!%p2277_p7)
}
 0x8e9   :  { %1726 = dma.vmem_to_hbm [thread:$0]  %s2948_s26, 128, %s3007_s8, [#allocation16]  }
 0x8ea   :  { %2287 = dma.done.wait [#allocation7], 1024  }
 0x8eb   :  { %2288 = vsyncadd [#allocation7], 4294966272 }
 0x8ec   :  { %2289 = dma.done.wait [#allocation16], 256  }
 0x8ed   :  { %2290 = vsyncadd [#allocation16], 4294967040 }
 0x8ee   :  { %1736 = vsyncpa [#allocation6], 1 }
 0x8ef   :  { %1737 = vsyncpa [#allocation9], 1 }
 0x8f0   :  { %1738 = vsyncpa [#allocation12], 1 }
 0x8f1   :  { %1739 = vsyncpa [#allocation7], 1 }
 0x8f2   :  { %1740 = vsyncpa [#allocation16], 1 }

</bundles_post_ra>
